<compile_context>
chip_gen: v7x
topology: tpu7x:2x2x1
jax: 0.10.0
libtpu: 0.0.40
codegen_flags: <defaults>
</compile_context>

<pallas_src>
import functools

import jax
import jax.numpy as jnp
from jax.experimental import pallas as pl
from jax.experimental.pallas import tpu as pltpu


def _round_up(x, m):
    return ((x + m - 1) // m) * m


def _pick_tile(requested, n128, cap=None):
    """Largest power-of-two multiple of 128 <= min(requested, cap, n128) that
    divides n128 (so padded N never inflates)."""
    cap = n128 if cap is None else cap
    limit = max(128, min(requested, cap, n128))
    t = 128
    while t * 2 <= limit:
        t *= 2
    while t > 128 and n128 % t != 0:
        t //= 2
    return t


# --------------------------------------------------------------------------- #
# Kernel 1:  Z = relu(A @ Y1) @ W2^T + b2
#   grid = (n_p/tm row tiles [parallel], n_p/tk contraction tiles [arbitrary])
#   A @ Y1 accumulates in a resident (tm, hid_p) f32 VMEM scratch; the finalize
#   applies relu and the fused layer-2 Linear, emitting Z in the compute dtype.
# --------------------------------------------------------------------------- #
def _layer1_fused_kernel(a_ref, y_ref, w2t_ref, b2_ref, z_ref, acc_ref):
    k = pl.program_id(1)

    @pl.when(k == 0)
    def _():
        acc_ref[...] = jnp.zeros_like(acc_ref)

    acc_ref[...] += jnp.dot(a_ref[...], y_ref[...],
                            preferred_element_type=jnp.float32)

    @pl.when(k == pl.num_programs(1) - 1)
    def _():
        h = jnp.maximum(acc_ref[...], 0.0).astype(w2t_ref.dtype)
        z = jnp.dot(h, w2t_ref[...], preferred_element_type=jnp.float32)
        z_ref[...] = (z + b2_ref[...]).astype(z_ref.dtype)


# --------------------------------------------------------------------------- #
# Kernel 2:  out = A @ Z   (f32 output block is the resident accumulator)
# --------------------------------------------------------------------------- #
def _propagate_kernel(a_ref, z_ref, o_ref):
    k = pl.program_id(1)

    @pl.when(k == 0)
    def _():
        o_ref[...] = jnp.zeros_like(o_ref)

    o_ref[...] += jnp.dot(a_ref[...], z_ref[...],
                          preferred_element_type=jnp.float32)


def _call_layer1(Ap, Yp, W2Tp, b2row, *, tm, tk, out_dtype):
    n_p = Ap.shape[0]
    hid_p = Yp.shape[1]
    out_p = W2Tp.shape[1]
    grid = (n_p // tm, n_p // tk)
    flops = 2 * n_p * n_p * hid_p + 2 * n_p * hid_p * out_p
    bytes_accessed = (
        n_p * n_p * Ap.dtype.itemsize                    # A read once
        + grid[0] * n_p * hid_p * Yp.dtype.itemsize      # Y1 re-read per row tile
        + hid_p * out_p * W2Tp.dtype.itemsize            # W2^T DMA'd once
        + out_p * b2row.dtype.itemsize                   # bias DMA'd once
        + n_p * out_p * jnp.dtype(out_dtype).itemsize)   # Z write
    return pl.pallas_call(
        _layer1_fused_kernel,
        out_shape=jax.ShapeDtypeStruct((n_p, out_p), out_dtype),
        grid=grid,
        in_specs=[
            pl.BlockSpec((tm, tk), lambda i, k: (i, k)),         # A tile
            pl.BlockSpec((tk, hid_p), lambda i, k: (k, 0)),      # Y1 K tile
            pl.BlockSpec((hid_p, out_p), lambda i, k: (0, 0)),   # W2^T (resident)
            pl.BlockSpec((1, out_p), lambda i, k: (0, 0)),       # b2 row (resident)
        ],
        out_specs=pl.BlockSpec((tm, out_p), lambda i, k: (i, 0)),
        scratch_shapes=[pltpu.VMEM((tm, hid_p), jnp.float32)],
        compiler_params=pltpu.CompilerParams(
            dimension_semantics=("parallel", "arbitrary"),
            vmem_limit_bytes=48 * 1024 * 1024),
        cost_estimate=pl.CostEstimate(flops=flops, transcendentals=0,
                                      bytes_accessed=bytes_accessed),
    )(Ap, Yp, W2Tp, b2row)


def _call_layer2(Ap, Zp, *, tm, tk):
    n_p = Ap.shape[0]
    out_p = Zp.shape[1]
    grid = (n_p // tm, n_p // tk)
    flops = 2 * n_p * n_p * out_p
    bytes_accessed = (n_p * n_p * Ap.dtype.itemsize
                      + grid[0] * n_p * out_p * Zp.dtype.itemsize
                      + n_p * out_p * 4)
    return pl.pallas_call(
        _propagate_kernel,
        out_shape=jax.ShapeDtypeStruct((n_p, out_p), jnp.float32),
        grid=grid,
        in_specs=[
            pl.BlockSpec((tm, tk), lambda i, k: (i, k)),         # A tile
            pl.BlockSpec((tk, out_p), lambda i, k: (k, 0)),      # Z K tile
        ],
        out_specs=pl.BlockSpec((tm, out_p), lambda i, k: (i, 0)),
        compiler_params=pltpu.CompilerParams(
            dimension_semantics=("parallel", "arbitrary"),
            vmem_limit_bytes=48 * 1024 * 1024),
        cost_estimate=pl.CostEstimate(flops=flops, transcendentals=0,
                                      bytes_accessed=bytes_accessed),
    )(Ap, Zp)


def _gcn_forward_padded(X, Ap, W1, b1, W2Tp, b2row, *, n, hidden, out_feats,
                        hid_p, tm, tk, compute_dtype):
    n_p = Ap.shape[0]
    # Tiny inner Linear, computed once per call in plain XLA (perf feedback:
    # do not recompute it per row tile inside the kernel), then padded/cast to a
    # lane-dense bf16 operand for the propagation kernel.
    y1 = X.astype(jnp.float32) @ W1.T.astype(jnp.float32) + b1.astype(jnp.float32)
    Yp = jnp.zeros((n_p, hid_p), compute_dtype).at[:n, :hidden].set(
        y1.astype(compute_dtype))
    # Kernel 1:  Z = relu(A @ Y1) @ W2^T + b2   (layer-2 Linear fused in epilogue)
    Z = _call_layer1(Ap, Yp, W2Tp, b2row, tm=tm, tk=tk, out_dtype=compute_dtype)
    # Kernel 2:  out = A @ Z
    O = _call_layer2(Ap, Z, tm=tm, tk=tk)
    return O[:n, :out_feats]


def make_gcn_forward(A, W1, b1, W2, b2, *, tm=512, tk=1024,
                     compute_dtype=jnp.bfloat16):
    """Pads/casts the static graph and weights ONCE; returns a jitted forward(X)."""
    N = A.shape[0]
    hidden, out_feats = W1.shape[0], W2.shape[0]

    n128 = _round_up(N, 128)
    hid_p = _round_up(hidden, 128)
    out_p = _round_up(out_feats, 128)
    # Row tile <= n/2 keeps the "parallel" grid axis >= 2 (both v7x TCs busy).
    tm = _pick_tile(tm, n128, cap=max(128, n128 // 2))
    tk = _pick_tile(tk, n128)
    n_p = n128  # tm | n_p and tk | n_p by construction -> no padding blow-up

    cd = compute_dtype
    # Padded/cast ONCE (not per forward call): the graph is static across calls.
    # TODO(synk): on v7x/v6e, A could additionally be stored fp8/int8 with
    # per-row scales applied in the finalize to halve the dominant HBM read.
    Ap = jnp.zeros((n_p, n_p), cd).at[:N, :N].set(A.astype(cd))
    W2Tp = jnp.zeros((hid_p, out_p), cd).at[:hidden, :out_feats].set(
        W2.T.astype(cd))
    b2row = jnp.zeros((1, out_p), jnp.float32).at[0, :out_feats].set(
        b2.astype(jnp.float32))
    W1f = W1.astype(jnp.float32)
    b1f = b1.astype(jnp.float32)

    fwd = jax.jit(functools.partial(
        _gcn_forward_padded, n=N, hidden=hidden, out_feats=out_feats,
        hid_p=hid_p, tm=tm, tk=tk, compute_dtype=cd))

    def forward(X):
        return fwd(X, Ap, W1f, b1f, W2Tp, b2row)

    return forward


if __name__ == "__main__":
    # Small shapes consistent with the module (graph with 512 nodes).
    N = 512
    in_feats, hidden_feats, out_feats = 8, 32, 16

    key = jax.random.PRNGKey(0)
    k_x, k_a, k_w1, k_b1, k_w2, k_b2 = jax.random.split(key, 6)

    X = jax.random.normal(k_x, (N, in_feats), dtype=jnp.float32)

    # Symmetric, row-normalized dense adjacency with self loops (deterministic).
    A_raw = (jax.random.uniform(k_a, (N, N)) > 0.95).astype(jnp.float32)
    A_sym = jnp.maximum(A_raw, A_raw.T) + jnp.eye(N, dtype=jnp.float32)
    A = A_sym / jnp.sum(A_sym, axis=1, keepdims=True)

    # nn.Linear parameters: W [out, in], b [out].
    W1 = 0.1 * jax.random.normal(k_w1, (hidden_feats, in_feats), dtype=jnp.float32)
    b1 = 0.1 * jax.random.normal(k_b1, (hidden_feats,), dtype=jnp.float32)
    W2 = 0.1 * jax.random.normal(k_w2, (out_feats, hidden_feats), dtype=jnp.float32)
    b2 = 0.1 * jax.random.normal(k_b2, (out_feats,), dtype=jnp.float32)

    # Pure-JAX reference matching the PyTorch module exactly:
    #   H = A @ fc1(X); H = relu(H); out = A @ fc2(H)
    ref_H = jnp.maximum(A @ (X @ W1.T + b1), 0.0)
    ref = A @ (ref_H @ W2.T + b2)

    # Default tiles: tm clamps to n_p/2 = 256 (two parallel row tiles), tk = 512.
    forward = make_gcn_forward(A, W1, b1, W2, b2)
    out = jax.block_until_ready(forward(X))
    assert out.shape == (N, out_feats)
    assert jnp.allclose(out, ref, atol=2e-2, rtol=2e-2), \
        float(jnp.max(jnp.abs(out - ref)))

    # Smaller tiles exercise the multi-step K reduction and the parallel row axis.
    forward_small = make_gcn_forward(A, W1, b1, W2, b2, tm=128, tk=128)
    out_small = jax.block_until_ready(forward_small(X))
    assert jnp.allclose(out_small, ref, atol=2e-2, rtol=2e-2), \
        float(jnp.max(jnp.abs(out_small - ref)))

    print("KERNEL_OK")
</pallas_src>

<mosaic_0001>
module attributes {stable_mosaic.version = 11 : i64} {
  func.func @_layer1_fused_kernel(%arg0: i32, %arg1: i32, %arg2: memref<256x512xbf16, #tpu.memory_space<vmem>>, %arg3: memref<512x128xbf16, #tpu.memory_space<vmem>>, %arg4: memref<128x128xbf16, #tpu.memory_space<vmem>>, %arg5: memref<1x128xf32, #tpu.memory_space<vmem>>, %arg6: memref<256x128xbf16, #tpu.memory_space<vmem>>, %arg7: memref<256x128xf32, #tpu.memory_space<vmem>>) attributes {dimension_semantics = [#tpu.dimension_semantics<parallel>, #tpu.dimension_semantics<arbitrary>], iteration_bounds = array<i64: 2, 1>, scalar_prefetch = 0 : i64, scratch_operands = 1 : i64, tpu.core_type = #tpu.core_type<tc>, window_params = [{transform_indices = @transform_0, window_bounds = array<i64: 256, 512>}, {transform_indices = @transform_1, window_bounds = array<i64: 512, 128>}, {pipeline_mode = #tpu.pipeline_mode<synchronous>, transform_indices = @transform_2, window_bounds = array<i64: 128, 128>}, {pipeline_mode = #tpu.pipeline_mode<synchronous>, transform_indices = @transform_3, window_bounds = array<i64: 1, 128>}, {transform_indices = @transform_4, window_bounds = array<i64: 256, 128>}]} {
    %c0_i32 = arith.constant 0 : i32
    %0 = arith.cmpi eq, %arg1, %c0_i32 : i32
    %1 = arith.extui %0 : i1 to i32
    %c0_i32_0 = arith.constant 0 : i32
    %2 = arith.cmpi ne, %1, %c0_i32_0 : i32
    scf.if %2 {
      %cst_10 = arith.constant 0.000000e+00 : f32
      %12 = vector.broadcast %cst_10 : f32 to vector<256x128xf32>
      %c0_11 = arith.constant 0 : index
      %c0_12 = arith.constant 0 : index
      %13 = vector.load %arg7[%c0_11, %c0_12] : memref<256x128xf32, #tpu.memory_space<vmem>>, vector<256x128xf32>
      tpu.vector_store %arg7[%c0_11, %c0_12], %12 {strides = array<i32>} : memref<256x128xf32, #tpu.memory_space<vmem>>, vector<256x128xf32>,
    } else {
    }
    %c0 = arith.constant 0 : index
    %c0_1 = arith.constant 0 : index
    %3 = vector.load %arg7[%c0, %c0_1] : memref<256x128xf32, #tpu.memory_space<vmem>>, vector<256x128xf32>
    %c0_2 = arith.constant 0 : index
    %c0_3 = arith.constant 0 : index
    %4 = vector.load %arg2[%c0_2, %c0_3] : memref<256x512xbf16, #tpu.memory_space<vmem>>, vector<256x512xbf16>
    %c0_4 = arith.constant 0 : index
    %c0_5 = arith.constant 0 : index
    %5 = vector.load %arg3[%c0_4, %c0_5] : memref<512x128xbf16, #tpu.memory_space<vmem>>, vector<512x128xbf16>
    %cst = arith.constant dense<0.000000e+00> : vector<256x128xf32>
    %6 = tpu.matmul %4, %5, %cst {dimension_numbers = #tpu.dot_dimension_numbers<[1], [0], [0], [1], [0, 0, 1, 1], [], []>} : vector<256x512xbf16>, vector<512x128xbf16>, vector<256x128xf32> -> vector<256x128xf32>
    %7 = arith.addf %3, %6 : vector<256x128xf32>
    %c0_6 = arith.constant 0 : index
    %c0_7 = arith.constant 0 : index
    %8 = vector.load %arg7[%c0_6, %c0_7] : memref<256x128xf32, #tpu.memory_space<vmem>>, vector<256x128xf32>
    tpu.vector_store %arg7[%c0_6, %c0_7], %7 {strides = array<i32>} : memref<256x128xf32, #tpu.memory_space<vmem>>, vector<256x128xf32>,
    %c0_i32_8 = arith.constant 0 : i32
    %9 = arith.cmpi eq, %arg1, %c0_i32_8 : i32
    %10 = arith.extui %9 : i1 to i32
    %c0_i32_9 = arith.constant 0 : i32
    %11 = arith.cmpi ne, %10, %c0_i32_9 : i32
    scf.if %11 {
      %c0_10 = arith.constant 0 : index
      %c0_11 = arith.constant 0 : index
      %12 = vector.load %arg7[%c0_10, %c0_11] : memref<256x128xf32, #tpu.memory_space<vmem>>, vector<256x128xf32>
      %cst_12 = arith.constant 0.000000e+00 : f32
      %13 = vector.broadcast %cst_12 : f32 to vector<256x128xf32>
      %14 = arith.maximumf %12, %13 : vector<256x128xf32>
      %15 = arith.truncf %14 : vector<256x128xf32> to vector<256x128xbf16>
      %c0_13 = arith.constant 0 : index
      %c0_14 = arith.constant 0 : index
      %16 = vector.load %arg4[%c0_13, %c0_14] : memref<128x128xbf16, #tpu.memory_space<vmem>>, vector<128x128xbf16>
      %cst_15 = arith.constant dense<0.000000e+00> : vector<256x128xf32>
      %17 = tpu.matmul %15, %16, %cst_15 {dimension_numbers = #tpu.dot_dimension_numbers<[1], [0], [0], [1], [0, 0, 1, 1], [], []>} : vector<256x128xbf16>, vector<128x128xbf16>, vector<256x128xf32> -> vector<256x128xf32>
      %c0_16 = arith.constant 0 : index
      %c0_17 = arith.constant 0 : index
      %18 = vector.load %arg5[%c0_16, %c0_17] : memref<1x128xf32, #tpu.memory_space<vmem>>, vector<1x128xf32>
      %19 = vector.broadcast %18 : vector<1x128xf32> to vector<256x128xf32>
      %20 = arith.addf %17, %19 : vector<256x128xf32>
      %21 = arith.truncf %20 : vector<256x128xf32> to vector<256x128xbf16>
      %c0_18 = arith.constant 0 : index
      %c0_19 = arith.constant 0 : index
      %22 = vector.load %arg6[%c0_18, %c0_19] : memref<256x128xbf16, #tpu.memory_space<vmem>>, vector<256x128xbf16>
      tpu.vector_store %arg6[%c0_18, %c0_19], %21 {strides = array<i32>} : memref<256x128xbf16, #tpu.memory_space<vmem>>, vector<256x128xbf16>,
    } else {
    }
    return
  }
  func.func @transform_0(%arg0: i32, %arg1: i32) -> (i32, i32) {
    %c0_i32 = arith.constant 0 : i32
    return %arg0, %arg1 : i32, i32
  }
  func.func @transform_1(%arg0: i32, %arg1: i32) -> (i32, i32) {
    %c0_i32 = arith.constant 0 : i32
    %c0_i32_0 = arith.constant 0 : i32
    return %arg1, %c0_i32 : i32, i32
  }
  func.func @transform_2(%arg0: i32, %arg1: i32) -> (i32, i32) {
    %c0_i32 = arith.constant 0 : i32
    %c0_i32_0 = arith.constant 0 : i32
    %c0_i32_1 = arith.constant 0 : i32
    return %c0_i32, %c0_i32_0 : i32, i32
  }
  func.func @transform_3(%arg0: i32, %arg1: i32) -> (i32, i32) {
    %c0_i32 = arith.constant 0 : i32
    %c0_i32_0 = arith.constant 0 : i32
    %c0_i32_1 = arith.constant 0 : i32
    return %c0_i32, %c0_i32_0 : i32, i32
  }
  func.func @transform_4(%arg0: i32, %arg1: i32) -> (i32, i32) {
    %c0_i32 = arith.constant 0 : i32
    %c0_i32_0 = arith.constant 0 : i32
    return %arg0, %c0_i32 : i32, i32
  }
}

module attributes {stable_mosaic.version = 11 : i64} {
  func.func @_propagate_kernel(%arg0: i32, %arg1: i32, %arg2: memref<256x512xbf16, #tpu.memory_space<vmem>>, %arg3: memref<512x128xbf16, #tpu.memory_space<vmem>>, %arg4: memref<256x128xf32, #tpu.memory_space<vmem>>) attributes {dimension_semantics = [#tpu.dimension_semantics<parallel>, #tpu.dimension_semantics<arbitrary>], iteration_bounds = array<i64: 2, 1>, scalar_prefetch = 0 : i64, scratch_operands = 0 : i64, tpu.core_type = #tpu.core_type<tc>, window_params = [{transform_indices = @transform_0, window_bounds = array<i64: 256, 512>}, {transform_indices = @transform_1, window_bounds = array<i64: 512, 128>}, {transform_indices = @transform_2, window_bounds = array<i64: 256, 128>}]} {
    %c0_i32 = arith.constant 0 : i32
    %0 = arith.cmpi eq, %arg1, %c0_i32 : i32
    %1 = arith.extui %0 : i1 to i32
    %c0_i32_0 = arith.constant 0 : i32
    %2 = arith.cmpi ne, %1, %c0_i32_0 : i32
    scf.if %2 {
      %cst_8 = arith.constant 0.000000e+00 : f32
      %9 = vector.broadcast %cst_8 : f32 to vector<256x128xf32>
      %c0_9 = arith.constant 0 : index
      %c0_10 = arith.constant 0 : index
      %10 = vector.load %arg4[%c0_9, %c0_10] : memref<256x128xf32, #tpu.memory_space<vmem>>, vector<256x128xf32>
      tpu.vector_store %arg4[%c0_9, %c0_10], %9 {strides = array<i32>} : memref<256x128xf32, #tpu.memory_space<vmem>>, vector<256x128xf32>,
    } else {
    }
    %c0 = arith.constant 0 : index
    %c0_1 = arith.constant 0 : index
    %3 = vector.load %arg4[%c0, %c0_1] : memref<256x128xf32, #tpu.memory_space<vmem>>, vector<256x128xf32>
    %c0_2 = arith.constant 0 : index
    %c0_3 = arith.constant 0 : index
    %4 = vector.load %arg2[%c0_2, %c0_3] : memref<256x512xbf16, #tpu.memory_space<vmem>>, vector<256x512xbf16>
    %c0_4 = arith.constant 0 : index
    %c0_5 = arith.constant 0 : index
    %5 = vector.load %arg3[%c0_4, %c0_5] : memref<512x128xbf16, #tpu.memory_space<vmem>>, vector<512x128xbf16>
    %cst = arith.constant dense<0.000000e+00> : vector<256x128xf32>
    %6 = tpu.matmul %4, %5, %cst {dimension_numbers = #tpu.dot_dimension_numbers<[1], [0], [0], [1], [0, 0, 1, 1], [], []>} : vector<256x512xbf16>, vector<512x128xbf16>, vector<256x128xf32> -> vector<256x128xf32>
    %7 = arith.addf %3, %6 : vector<256x128xf32>
    %c0_6 = arith.constant 0 : index
    %c0_7 = arith.constant 0 : index
    %8 = vector.load %arg4[%c0_6, %c0_7] : memref<256x128xf32, #tpu.memory_space<vmem>>, vector<256x128xf32>
    tpu.vector_store %arg4[%c0_6, %c0_7], %7 {strides = array<i32>} : memref<256x128xf32, #tpu.memory_space<vmem>>, vector<256x128xf32>,
    return
  }
  func.func @transform_0(%arg0: i32, %arg1: i32) -> (i32, i32) {
    %c0_i32 = arith.constant 0 : i32
    return %arg0, %arg1 : i32, i32
  }
  func.func @transform_1(%arg0: i32, %arg1: i32) -> (i32, i32) {
    %c0_i32 = arith.constant 0 : i32
    %c0_i32_0 = arith.constant 0 : i32
    return %arg1, %c0_i32 : i32, i32
  }
  func.func @transform_2(%arg0: i32, %arg1: i32) -> (i32, i32) {
    %c0_i32 = arith.constant 0 : i32
    %c0_i32_0 = arith.constant 0 : i32
    return %arg0, %c0_i32 : i32, i32
  }
}

</mosaic_0001>

<bundles_post_ra>
// kernel: _gcn_forward_padded.3
= control target key start
LH: loop header
LB: loop body
LE: loop exit
PB: predicated region body
PF: predicated region fallthrough
CT: control target
= control target key end

     0   :  { %s1907_s9 = smov 0   ;;  %s1909_s10 = smov 0   ;;  %s2143_s0 = inlined_call_operand.vmem [shape: bf16[512,512], index: 0, kind: input, shape index: {}]   ;;  %s2144_s1 = inlined_call_operand.vmem [shape: bf16[512,128], index: 1, kind: input, shape index: {}]   ;;  %s2145_s2 = inlined_call_operand.vmem [shape: f32[512,128], index: 2, kind: output, shape index: {}]  }
   0x1   :  { %s1911_s11 = smov 0  }
   0x2 LB: > { %s24_s12 = sadd.s32 1, %s1886_s10  ;;  %p1386_p0 = scmp.ge.s32.totalorder %s1890_s11, 1  ;;  %s1890_s11 = sphi %s1911_s11, %s12_s11   ;;  %s1886_s10 = sphi %s1909_s10, %s2147_s10   ;;  %s1882_s9 = sphi %s1907_s9, %s2146_s9  }
   0x3   : > { %p26_p1 = scmp.ge.s32.totalorder %s24_s12, 2  ;;  %p144_p2 = scmp.lt.s32.totalorder %s1890_s11, 3 }
   0x5   : > { %s2149_s12 = smov (%p26_p1, %s24_s12), 0  ;;  %p145_p3 = pnand %p1386_p0, %p144_p2 }
   0x6   : > { %v1740_v0 = vld [vmem:[%s2144_s1 + $0x40] sm:$0xff] (!%p145_p3)   ;;  %v1744_v4 = vld [vmem:[%s2144_s1 + $0x48] sm:$0xff] (!%p145_p3)   ;;  %v1748_v8 = vld [vmem:[%s2144_s1 + $0x50] sm:$0xff] (!%p145_p3)   ;;  %s1387_s21 = sshll.u32 (!%p145_p3), %s1882_s9, 5 }
   0x7   : > { %148 = sbr.rel (%p145_p3) target bundleno = 381 (0x17d), region = 28  ;;  %v1741_v1 = vld [vmem:[%s2144_s1 + $0xc0] sm:$0xff] (!%p145_p3)   ;;  %1491 = vmatprep.subr.bf16.mxu0 (!%p145_p3), %v1740_v0  ;;  %v1745_v5 = vld [vmem:[%s2144_s1 + $0xc8] sm:$0xff] (!%p145_p3)   ;;  %v1749_v9 = vld [vmem:[%s2144_s1 + $0xd0] sm:$0xff] (!%p145_p3)   ;;  %p178_p4 = scmp.lt.s32.totalorder (!%p145_p3), %s1387_s21, 63 }
   0x8   : > { %v1742_v2 = vld [vmem:[%s2144_s1] sm:$0xff] (!%p145_p3)   ;;  %1603 = vmatprep.subr.bf16.mxu1 (!%p145_p3), %v1741_v1  ;;  %v1746_v6 = vld [vmem:[%s2144_s1 + $0x8] sm:$0xff] (!%p145_p3)   ;;  %v1750_v10 = vld [vmem:[%s2144_s1 + $0x10] sm:$0xff] (!%p145_p3)  }
   0x9   : > { %v1743_v3 = vld [vmem:[%s2144_s1 + $0x80] sm:$0xff] (!%p145_p3)   ;;  %1492 = vmatpush3.bf16.msra.mxu0 (!%p145_p3), %v1742_v2  ;;  %v1747_v7 = vld [vmem:[%s2144_s1 + $0x88] sm:$0xff] (!%p145_p3)   ;;  %v1751_v11 = vld [vmem:[%s2144_s1 + $0x90] sm:$0xff] (!%p145_p3)  }
   0xa   : > { %1604 = vmatpush3.bf16.msra.mxu1 (!%p145_p3), %v1743_v3  ;;  %1493 = vmatprep.subr.bf16.mxu0 (!%p145_p3), %v1744_v4  ;;  %v1752_v12 = vld [vmem:[%s2144_s1 + $0x58] sm:$0xff] (!%p145_p3)   ;;  %v1756_v16 = vld [vmem:[%s2144_s1 + $0x60] sm:$0xff] (!%p145_p3)   ;;  %v1760_v20 = vld [vmem:[%s2144_s1 + $0x68] sm:$0xff] (!%p145_p3)  }
   0xb   : > { %1605 = vmatprep.subr.bf16.mxu1 (!%p145_p3), %v1745_v5  ;;  %v1753_v13 = vld [vmem:[%s2144_s1 + $0xd8] sm:$0xff] (!%p145_p3)   ;;  %v1757_v17 = vld [vmem:[%s2144_s1 + $0xe0] sm:$0xff] (!%p145_p3)   ;;  %v1761_v21 = vld [vmem:[%s2144_s1 + $0xe8] sm:$0xff] (!%p145_p3)  }
   0xc   : > { %v1754_v14 = vld [vmem:[%s2144_s1 + $0x18] sm:$0xff] (!%p145_p3)   ;;  %v1758_v18 = vld [vmem:[%s2144_s1 + $0x20] sm:$0xff] (!%p145_p3)   ;;  %v1762_v22 = vld [vmem:[%s2144_s1 + $0x28] sm:$0xff] (!%p145_p3)  }
   0xd   : > { %1494 = vmatpush3.bf16.msra.mxu0 (!%p145_p3), %v1746_v6  ;;  %v1755_v15 = vld [vmem:[%s2144_s1 + $0x98] sm:$0xff] (!%p145_p3)   ;;  %v1759_v19 = vld [vmem:[%s2144_s1 + $0xa0] sm:$0xff] (!%p145_p3)   ;;  %v1763_v23 = vld [vmem:[%s2144_s1 + $0xa8] sm:$0xff] (!%p145_p3)  }
   0xe   : > { %1606 = vmatpush3.bf16.msra.mxu1 %v1747_v7  ;;  %1495 = vmatprep.subr.bf16.mxu0 %v1748_v8  ;;  %s2151_s21 = smov (!%p178_p4, %s1387_s21), 63  ;;  %v1764_v24 = vld [vmem:[%s2144_s1 + $0x70] sm:$0xff]   ;;  %v1768_v28 = vld [vmem:[%s2144_s1 + $0x78] sm:$0xff]  }
   0xf   : > { %1607 = vmatprep.subr.bf16.mxu1 %v1749_v9  ;;  %v1765_v25 = vld [vmem:[%s2144_s1 + $0xf0] sm:$0xff]   ;;  %s1490_s19 = sshll.u32 %s2151_s21, 4  ;;  %v1769_v29 = vld [vmem:[%s2144_s1 + $0xf8] sm:$0xff]   ;;  %s1391_s5 = sshll.u32 %s2151_s21, 3 }
  0x10   : > { %v1766_v26 = vld [vmem:[%s2144_s1 + $0x30] sm:$0xff]   ;;  %s2024_s29 = scalar_lea.vmem %s2143_s0, %s1490_s19  ;;  %v1770_v30 = vld [vmem:[%s2144_s1 + $0x38] sm:$0xff]   ;;  %s2100_s8 = scalar_lea.vmem %s2145_s2, %s1391_s5 }
  0x11   : > { %1496 = vmatpush3.bf16.msra.mxu0 %v1750_v10  ;;  %v1767_v27 = vld [vmem:[%s2144_s1 + $0xb0] sm:$0xff]   ;;  %v1771_v31 = vld [vmem:[%s2144_s1 + $0xb8] sm:$0xff]  }
  0x12   : > { %1608 = vmatpush3.bf16.msra.mxu1 %v1751_v11  ;;  %1497 = vmatprep.subr.bf16.mxu0 %v1752_v12  ;;  %v1772_v32 = vld [vmem:[%s2024_s29] ss:$16 sps:$4 sm:$0xff]   ;;  %v1774_v33 = vld [vmem:[%s2024_s29 + $0x4] ss:$16 sps:$4 sm:$0xff]   ;;  %v1775_v34 = vld [vmem:[%s2024_s29 + $0x8] ss:$16 sps:$4 sm:$0xff]  }
  0x13   : > { %1609 = vmatprep.subr.bf16.mxu1 %v1753_v13  ;;  %v1777_v35 = vld [vmem:[%s2024_s29 + $0xc] ss:$16 sps:$4 sm:$0xff]   ;;  %941 = vmatprep.mubr.bf16.mxu0 %v1774_v33  ;;  %v1778_v36 = vld [vmem:[%s2024_s29 + $0x24] ss:$16 sps:$4 sm:$0xff]   ;;  %v1782_v38 = vld [vmem:[%s2024_s29 + $0x20] ss:$16 sps:$4 sm:$0xff]  }
  0x14   : > { %1102 = vmatprep.mubr.bf16.mxu1 %v1777_v35  ;;  %v1780_v37 = vld [vmem:[%s2024_s29 + $0x2c] ss:$16 sps:$4 sm:$0xff]   ;;  %v1783_v39 = vld [vmem:[%s2024_s29 + $0x28] ss:$16 sps:$4 sm:$0xff]   ;;  %v1784_v40 = vld [vmem:[%s2024_s29 + $0x44] ss:$16 sps:$4 sm:$0xff]  }
  0x15   : > { %1498 = vmatpush3.bf16.msra.mxu0 %v1754_v14  ;;  %v1786_v41 = vld [vmem:[%s2024_s29 + $0x4c] ss:$16 sps:$4 sm:$0xff]   ;;  %v1788_v42 = vld [vmem:[%s2024_s29 + $0x40] ss:$16 sps:$4 sm:$0xff]   ;;  %v1789_v43 = vld [vmem:[%s2024_s29 + $0x48] ss:$16 sps:$4 sm:$0xff]  }
  0x16   : > { %1610 = vmatpush3.bf16.msra.mxu1 %v1755_v15  ;;  %1499 = vmatprep.subr.bf16.mxu0 %v1756_v16  ;;  %v1790_v44 = vld [vmem:[%s2024_s29 + $0x64] ss:$16 sps:$4 sm:$0xff]   ;;  %v1792_v45 = vld [vmem:[%s2024_s29 + $0x6c] ss:$16 sps:$4 sm:$0xff]   ;;  %v1794_v46 = vld [vmem:[%s2024_s29 + $0x60] ss:$16 sps:$4 sm:$0xff]  }
  0x17   : > { %1611 = vmatprep.subr.bf16.mxu1 %v1757_v17  ;;  %v1795_v47 = vld [vmem:[%s2024_s29 + $0x68] ss:$16 sps:$4 sm:$0xff]   ;;  %v1796_v48 = vld [vmem:[%s2024_s29 + $0x84] ss:$16 sps:$4 sm:$0xff]   ;;  %v1798_v49 = vld [vmem:[%s2024_s29 + $0x8c] ss:$16 sps:$4 sm:$0xff]  }
  0x18   : > { %v1800_v50 = vld [vmem:[%s2024_s29 + $0x80] ss:$16 sps:$4 sm:$0xff]   ;;  %v1801_v51 = vld [vmem:[%s2024_s29 + $0x88] ss:$16 sps:$4 sm:$0xff]   ;;  %v1802_v52 = vld [vmem:[%s2024_s29 + $0xa4] ss:$16 sps:$4 sm:$0xff]  }
  0x19   : > { %1500 = vmatpush3.bf16.msra.mxu0 %v1758_v18  ;;  %v1804_v53 = vld [vmem:[%s2024_s29 + $0xac] ss:$16 sps:$4 sm:$0xff]   ;;  %v1806_v54 = vld [vmem:[%s2024_s29 + $0xa0] ss:$16 sps:$4 sm:$0xff]   ;;  %v1807_v55 = vld [vmem:[%s2024_s29 + $0xa8] ss:$16 sps:$4 sm:$0xff]  }
  0x1a   : > { %1612 = vmatpush3.bf16.msra.mxu1 %v1759_v19  ;;  %1501 = vmatprep.subr.bf16.mxu0 %v1760_v20  ;;  %v1808_v56 = vld [vmem:[%s2024_s29 + $0xc4] ss:$16 sps:$4 sm:$0xff]   ;;  %v1810_v57 = vld [vmem:[%s2024_s29 + $0xcc] ss:$16 sps:$4 sm:$0xff]   ;;  %v1812_v58 = vld [vmem:[%s2024_s29 + $0xc0] ss:$16 sps:$4 sm:$0xff]  }
  0x1b   : > { %1613 = vmatprep.subr.bf16.mxu1 %v1761_v21  ;;  %v1813_v59 = vld [vmem:[%s2024_s29 + $0xc8] ss:$16 sps:$4 sm:$0xff]   ;;  %v1814_v60 = vld [vmem:[%s2024_s29 + $0xe4] ss:$16 sps:$4 sm:$0xff]   ;;  %v1816_v61 = vld [vmem:[%s2024_s29 + $0xec] ss:$16 sps:$4 sm:$0xff]  }
  0x1c   : > { %v1818_v62 = vld [vmem:[%s2024_s29 + $0xe0] ss:$16 sps:$4 sm:$0xff]   ;;  %v1819_v63 = vld [vmem:[%s2024_s29 + $0xe8] ss:$16 sps:$4 sm:$0xff]   ;;  %v1820_v0 = vld [vmem:[%s2024_s29 + $0x104] ss:$16 sps:$4 sm:$0xff]  }
  0x1d   : > { %1502 = vmatpush3.bf16.msra.mxu0 %v1762_v22  ;;  %v1822_v1 = vld [vmem:[%s2024_s29 + $0x10c] ss:$16 sps:$4 sm:$0xff]   ;;  %v1824_v2 = vld [vmem:[%s2024_s29 + $0x100] ss:$16 sps:$4 sm:$0xff]   ;;  %v1825_v3 = vld [vmem:[%s2024_s29 + $0x108] ss:$16 sps:$4 sm:$0xff]  }
  0x1e   : > { %1614 = vmatpush3.bf16.msra.mxu1 %v1763_v23  ;;  %1503 = vmatprep.subr.bf16.mxu0 %v1764_v24  ;;  %v1826_v4 = vld [vmem:[%s2024_s29 + $0x124] ss:$16 sps:$4 sm:$0xff]   ;;  %v1828_v5 = vld [vmem:[%s2024_s29 + $0x12c] ss:$16 sps:$4 sm:$0xff]   ;;  %v1830_v6 = vld [vmem:[%s2024_s29 + $0x120] ss:$16 sps:$4 sm:$0xff]  }
  0x1f   : > { %1615 = vmatprep.subr.bf16.mxu1 %v1765_v25  ;;  %v1831_v7 = vld [vmem:[%s2024_s29 + $0x128] ss:$16 sps:$4 sm:$0xff]   ;;  %v1832_v8 = vld [vmem:[%s2024_s29 + $0x144] ss:$16 sps:$4 sm:$0xff]   ;;  %v1834_v9 = vld [vmem:[%s2024_s29 + $0x14c] ss:$16 sps:$4 sm:$0xff]  }
  0x20   : > { %v1836_v10 = vld [vmem:[%s2024_s29 + $0x140] ss:$16 sps:$4 sm:$0xff]   ;;  %v1837_v11 = vld [vmem:[%s2024_s29 + $0x148] ss:$16 sps:$4 sm:$0xff]   ;;  %v1838_v12 = vld [vmem:[%s2024_s29 + $0x164] ss:$16 sps:$4 sm:$0xff]  }
  0x21   : > { %1504 = vmatpush3.bf16.msra.mxu0 %v1766_v26  ;;  %v1840_v13 = vld [vmem:[%s2024_s29 + $0x16c] ss:$16 sps:$4 sm:$0xff]   ;;  %v1842_v14 = vld [vmem:[%s2024_s29 + $0x160] ss:$16 sps:$4 sm:$0xff]   ;;  %v1843_v15 = vld [vmem:[%s2024_s29 + $0x168] ss:$16 sps:$4 sm:$0xff]  }
  0x22   : > { %1616 = vmatpush3.bf16.msra.mxu1 %v1767_v27  ;;  %1505 = vmatprep.subr.bf16.mxu0 %v1768_v28  ;;  %v1844_v16 = vld [vmem:[%s2024_s29 + $0x184] ss:$16 sps:$4 sm:$0xff]   ;;  %v1846_v17 = vld [vmem:[%s2024_s29 + $0x18c] ss:$16 sps:$4 sm:$0xff]   ;;  %v1848_v18 = vld [vmem:[%s2024_s29 + $0x180] ss:$16 sps:$4 sm:$0xff]  }
  0x23   : > { %1617 = vmatprep.subr.bf16.mxu1 %v1769_v29  ;;  %v1849_v19 = vld [vmem:[%s2024_s29 + $0x188] ss:$16 sps:$4 sm:$0xff]   ;;  %v1850_v20 = vld [vmem:[%s2024_s29 + $0x1a4] ss:$16 sps:$4 sm:$0xff]   ;;  %v1852_v21 = vld [vmem:[%s2024_s29 + $0x1ac] ss:$16 sps:$4 sm:$0xff]  }
  0x24   : > { %v1854_v22 = vld [vmem:[%s2024_s29 + $0x1a0] ss:$16 sps:$4 sm:$0xff]   ;;  %v1855_v23 = vld [vmem:[%s2024_s29 + $0x1a8] ss:$16 sps:$4 sm:$0xff]   ;;  %v1856_v24 = vld [vmem:[%s2024_s29 + $0x1c4] ss:$16 sps:$4 sm:$0xff]  }
  0x25   : > { %1506 = vmatpush3.bf16.msra.mxu0 %v1770_v30  ;;  %v1858_v25 = vld [vmem:[%s2024_s29 + $0x1cc] ss:$16 sps:$4 sm:$0xff]   ;;  %v1860_v26 = vld [vmem:[%s2024_s29 + $0x1c0] ss:$16 sps:$4 sm:$0xff]   ;;  %v1861_v27 = vld [vmem:[%s2024_s29 + $0x1c8] ss:$16 sps:$4 sm:$0xff]  }
  0x26   : > { %1618 = vmatpush3.bf16.msra.mxu1 %v1771_v31  ;;  %v1862_v28 = vld [vmem:[%s2024_s29 + $0x1e4] ss:$16 sps:$4 sm:$0xff]   ;;  %v1864_v29 = vld [vmem:[%s2024_s29 + $0x1ec] ss:$16 sps:$4 sm:$0xff]   ;;  %v1866_v30 = vld [vmem:[%s2024_s29 + $0x1e0] ss:$16 sps:$4 sm:$0xff]  }
  0x27   : > { %v1867_v31 = vld [vmem:[%s2024_s29 + $0x1e8] ss:$16 sps:$4 sm:$0xff]  }
  0x28   : > { %942 = vmatmul.mubr.bf16.vlgmr.msra.gmra.mrb[0].mxu0 %v1772_v32 }
  0x29   : > { %1103 = vmatmul.mubr.bf16.vlgmr.msra.gmra.mrb[0].mxu1 %v1775_v34  ;;  %949 = vmatprep.mubr.bf16.mxu0 %v1778_v36 }
  0x2a   : > { %1110 = vmatprep.mubr.bf16.mxu1 %v1780_v37 }
  0x30   : > { %950 = vmatmul.mubr.bf16.gmra.mrb[4].mxu0 %v1782_v38 }
  0x31   : > { %1111 = vmatmul.mubr.bf16.gmra.mrb[4].mxu1 %v1783_v39  ;;  %957 = vmatprep.mubr.bf16.mxu0 %v1784_v40 }
  0x32   : > { %1118 = vmatprep.mubr.bf16.mxu1 %v1786_v41 }
  0x38   : > { %958 = vmatmul.mubr.bf16.gmra.mrb[8].mxu0 %v1788_v42 }
  0x39   : > { %1119 = vmatmul.mubr.bf16.gmra.mrb[8].mxu1 %v1789_v43  ;;  %965 = vmatprep.mubr.bf16.mxu0 %v1790_v44 }
  0x3a   : > { %1126 = vmatprep.mubr.bf16.mxu1 %v1792_v45 }
  0x40   : > { %966 = vmatmul.mubr.bf16.gmra.mrb[12].mxu0 %v1794_v46 }
  0x41   : > { %1127 = vmatmul.mubr.bf16.gmra.mrb[12].mxu1 %v1795_v47  ;;  %973 = vmatprep.mubr.bf16.mxu0 %v1796_v48 }
  0x42   : > { %1134 = vmatprep.mubr.bf16.mxu1 %v1798_v49 }
  0x48   : > { %974 = vmatmul.mubr.bf16.gmra.mrb[16].mxu0 %v1800_v50 }
  0x49   : > { %1135 = vmatmul.mubr.bf16.gmra.mrb[16].mxu1 %v1801_v51  ;;  %981 = vmatprep.mubr.bf16.mxu0 %v1802_v52 }
  0x4a   : > { %1142 = vmatprep.mubr.bf16.mxu1 %v1804_v53 }
  0x50   : > { %982 = vmatmul.mubr.bf16.gmra.mrb[20].mxu0 %v1806_v54 }
  0x51   : > { %1143 = vmatmul.mubr.bf16.gmra.mrb[20].mxu1 %v1807_v55  ;;  %989 = vmatprep.mubr.bf16.mxu0 %v1808_v56 }
  0x52   : > { %1150 = vmatprep.mubr.bf16.mxu1 %v1810_v57 }
  0x58   : > { %990 = vmatmul.mubr.bf16.gmra.mrb[24].mxu0 %v1812_v58 }
  0x59   : > { %1151 = vmatmul.mubr.bf16.gmra.mrb[24].mxu1 %v1813_v59  ;;  %997 = vmatprep.mubr.bf16.mxu0 %v1814_v60 }
  0x5a   : > { %1158 = vmatprep.mubr.bf16.mxu1 %v1816_v61 }
  0x60   : > { %998 = vmatmul.mubr.bf16.gmra.mrb[28].mxu0 %v1818_v62 }
  0x61   : > { %1159 = vmatmul.mubr.bf16.gmra.mrb[28].mxu1 %v1819_v63  ;;  %1005 = vmatprep.mubr.bf16.mxu0 %v1820_v0 }
  0x62   : > { %1166 = vmatprep.mubr.bf16.mxu1 %v1822_v1 }
  0x68   : > { %1006 = vmatmul.mubr.bf16.gmra.mrb[32].mxu0 %v1824_v2 }
  0x69   : > { %1167 = vmatmul.mubr.bf16.gmra.mrb[32].mxu1 %v1825_v3  ;;  %1013 = vmatprep.mubr.bf16.mxu0 %v1826_v4 }
  0x6a   : > { %1174 = vmatprep.mubr.bf16.mxu1 %v1828_v5 }
  0x70   : > { %1014 = vmatmul.mubr.bf16.gmra.mrb[36].mxu0 %v1830_v6 }
  0x71   : > { %1175 = vmatmul.mubr.bf16.gmra.mrb[36].mxu1 %v1831_v7  ;;  %1021 = vmatprep.mubr.bf16.mxu0 %v1832_v8 }
  0x72   : > { %1182 = vmatprep.mubr.bf16.mxu1 %v1834_v9 }
  0x78   : > { %1022 = vmatmul.mubr.bf16.gmra.mrb[40].mxu0 %v1836_v10 }
  0x79   : > { %1183 = vmatmul.mubr.bf16.gmra.mrb[40].mxu1 %v1837_v11  ;;  %1029 = vmatprep.mubr.bf16.mxu0 %v1838_v12 }
  0x7a   : > { %1190 = vmatprep.mubr.bf16.mxu1 %v1840_v13 }
  0x80   : > { %1030 = vmatmul.mubr.bf16.gmra.mrb[44].mxu0 %v1842_v14 }
  0x81   : > { %1191 = vmatmul.mubr.bf16.gmra.mrb[44].mxu1 %v1843_v15  ;;  %1037 = vmatprep.mubr.bf16.mxu0 %v1844_v16 }
  0x82   : > { %1198 = vmatprep.mubr.bf16.mxu1 %v1846_v17 }
  0x88   : > { %1038 = vmatmul.mubr.bf16.gmra.mrb[48].mxu0 %v1848_v18 }
  0x89   : > { %1199 = vmatmul.mubr.bf16.gmra.mrb[48].mxu1 %v1849_v19  ;;  %1045 = vmatprep.mubr.bf16.mxu0 %v1850_v20 }
  0x8a   : > { %1206 = vmatprep.mubr.bf16.mxu1 %v1852_v21 }
  0x90   : > { %1046 = vmatmul.mubr.bf16.gmra.mrb[52].mxu0 %v1854_v22 }
  0x91   : > { %1207 = vmatmul.mubr.bf16.gmra.mrb[52].mxu1 %v1855_v23  ;;  %1053 = vmatprep.mubr.bf16.mxu0 %v1856_v24 }
  0x92   : > { %1214 = vmatprep.mubr.bf16.mxu1 %v1858_v25 }
  0x98   : > { %1054 = vmatmul.mubr.bf16.gmra.mrb[56].mxu0 %v1860_v26 }
  0x99   : > { %1215 = vmatmul.mubr.bf16.gmra.mrb[56].mxu1 %v1861_v27  ;;  %1061 = vmatprep.mubr.bf16.mxu0 %v1862_v28 }
  0x9a   : > { %1222 = vmatprep.mubr.bf16.mxu1 %v1864_v29 }
  0xa0   : > { %1062 = vmatmul.mubr.bf16.gmra.mrb[60].mxu0 %v1866_v30 }
  0xa1   : > { %1223 = vmatmul.mubr.bf16.gmra.mrb[60].mxu1 %v1867_v31 }
  0xfb   : > { %v1507_v32 = vpop.f32.mrb[0].mxu0 }
  0xfc   : > { %v1619_v33 = vpop.f32.mrb[0].mxu1  ;;  %v1508_v34 = vpop.f32.mrb[1].mxu0 }
  0xfd   : > { %v1509_v35 = vadd.f32 %v1508_v34, %v1507_v32  ;;  %v1620_v36 = vpop.f32.mrb[1].mxu1  ;;  %v1510_v37 = vpop.f32.mrb[2].mxu0 }
  0xfe   : > { %v1621_v38 = vadd.f32 %v1620_v36, %v1619_v33  ;;  %v1622_v39 = vpop.f32.mrb[2].mxu1  ;;  %v1511_v40 = vpop.f32.mrb[3].mxu0 }
  0xff   : > { %v1512_v41 = vadd.f32 %v1511_v40, %v1510_v37  ;;  %v1623_v42 = vpop.f32.mrb[3].mxu1 }
 0x100   : > { %v1105_v43 = vadd.f32 %v1621_v38, %v1509_v35  ;;  %v1624_v44 = vadd.f32 %v1623_v42, %v1622_v39 }
 0x102   : > { %v1108_v45 = vadd.f32 %v1624_v44, %v1512_v41  ;;  %1263 = vst [vmem:[%s2100_s8] sm:$0xff] %v1105_v43 }
 0x103   : > { %v1513_v46 = vpop.f32.mrb[4].mxu0 }
 0x104   : > { %v1625_v47 = vpop.f32.mrb[4].mxu1  ;;  %v1514_v48 = vpop.f32.mrb[5].mxu0  ;;  %1264 = vst [vmem:[%s2100_s8 + $0x8] sm:$0xff] %v1108_v45 }
 0x105   : > { %v1515_v49 = vadd.f32 %v1514_v48, %v1513_v46  ;;  %v1626_v50 = vpop.f32.mrb[5].mxu1  ;;  %v1516_v51 = vpop.f32.mrb[6].mxu0 }
 0x106   : > { %v1627_v52 = vadd.f32 %v1626_v50, %v1625_v47  ;;  %v1628_v53 = vpop.f32.mrb[6].mxu1  ;;  %v1517_v54 = vpop.f32.mrb[7].mxu0 }
 0x107   : > { %v1518_v55 = vadd.f32 %v1517_v54, %v1516_v51  ;;  %v1629_v56 = vpop.f32.mrb[7].mxu1 }
 0x108   : > { %v1113_v57 = vadd.f32 %v1627_v52, %v1515_v49  ;;  %v1630_v58 = vadd.f32 %v1629_v56, %v1628_v53 }
 0x10a   : > { %v1116_v59 = vadd.f32 %v1630_v58, %v1518_v55  ;;  %1265 = vst [vmem:[%s2100_s8 + $0x10] sm:$0xff] %v1113_v57 }
 0x10b   : > { %v1519_v60 = vpop.f32.mrb[8].mxu0 }
 0x10c   : > { %v1631_v61 = vpop.f32.mrb[8].mxu1  ;;  %v1520_v62 = vpop.f32.mrb[9].mxu0  ;;  %1266 = vst [vmem:[%s2100_s8 + $0x18] sm:$0xff] %v1116_v59 }
 0x10d   : > { %v1521_v63 = vadd.f32 %v1520_v62, %v1519_v60  ;;  %v1632_v0 = vpop.f32.mrb[9].mxu1  ;;  %v1522_v1 = vpop.f32.mrb[10].mxu0 }
 0x10e   : > { %v1633_v2 = vadd.f32 %v1632_v0, %v1631_v61  ;;  %v1634_v3 = vpop.f32.mrb[10].mxu1  ;;  %v1523_v4 = vpop.f32.mrb[11].mxu0 }
 0x10f   : > { %v1524_v5 = vadd.f32 %v1523_v4, %v1522_v1  ;;  %v1635_v6 = vpop.f32.mrb[11].mxu1 }
 0x110   : > { %v1121_v7 = vadd.f32 %v1633_v2, %v1521_v63  ;;  %v1636_v8 = vadd.f32 %v1635_v6, %v1634_v3 }
 0x112   : > { %v1124_v9 = vadd.f32 %v1636_v8, %v1524_v5  ;;  %1267 = vst [vmem:[%s2100_s8 + $0x20] sm:$0xff] %v1121_v7 }
 0x113   : > { %v1525_v10 = vpop.f32.mrb[12].mxu0 }
 0x114   : > { %v1637_v11 = vpop.f32.mrb[12].mxu1  ;;  %v1526_v12 = vpop.f32.mrb[13].mxu0  ;;  %1268 = vst [vmem:[%s2100_s8 + $0x28] sm:$0xff] %v1124_v9 }
 0x115   : > { %v1527_v13 = vadd.f32 %v1526_v12, %v1525_v10  ;;  %v1638_v14 = vpop.f32.mrb[13].mxu1  ;;  %v1528_v15 = vpop.f32.mrb[14].mxu0 }
 0x116   : > { %v1639_v16 = vadd.f32 %v1638_v14, %v1637_v11  ;;  %v1640_v17 = vpop.f32.mrb[14].mxu1  ;;  %v1529_v18 = vpop.f32.mrb[15].mxu0 }
 0x117   : > { %v1530_v19 = vadd.f32 %v1529_v18, %v1528_v15  ;;  %v1641_v20 = vpop.f32.mrb[15].mxu1 }
 0x118   : > { %v1129_v21 = vadd.f32 %v1639_v16, %v1527_v13  ;;  %v1642_v22 = vadd.f32 %v1641_v20, %v1640_v17 }
 0x11a   : > { %v1132_v23 = vadd.f32 %v1642_v22, %v1530_v19  ;;  %1269 = vst [vmem:[%s2100_s8 + $0x30] sm:$0xff] %v1129_v21 }
 0x11b   : > { %v1531_v24 = vpop.f32.mrb[16].mxu0 }
 0x11c   : > { %v1643_v25 = vpop.f32.mrb[16].mxu1  ;;  %v1532_v26 = vpop.f32.mrb[17].mxu0  ;;  %1270 = vst [vmem:[%s2100_s8 + $0x38] sm:$0xff] %v1132_v23 }
 0x11d   : > { %v1533_v27 = vadd.f32 %v1532_v26, %v1531_v24  ;;  %v1644_v28 = vpop.f32.mrb[17].mxu1  ;;  %v1534_v29 = vpop.f32.mrb[18].mxu0 }
 0x11e   : > { %v1645_v30 = vadd.f32 %v1644_v28, %v1643_v25  ;;  %v1646_v31 = vpop.f32.mrb[18].mxu1  ;;  %v1535_v32 = vpop.f32.mrb[19].mxu0 }
 0x11f   : > { %v1536_v33 = vadd.f32 %v1535_v32, %v1534_v29  ;;  %v1647_v34 = vpop.f32.mrb[19].mxu1 }
 0x120   : > { %v1137_v35 = vadd.f32 %v1645_v30, %v1533_v27  ;;  %v1648_v36 = vadd.f32 %v1647_v34, %v1646_v31 }
 0x122   : > { %v1140_v37 = vadd.f32 %v1648_v36, %v1536_v33  ;;  %1271 = vst [vmem:[%s2100_s8 + $0x40] sm:$0xff] %v1137_v35 }
 0x123   : > { %v1537_v38 = vpop.f32.mrb[20].mxu0 }
 0x124   : > { %v1649_v39 = vpop.f32.mrb[20].mxu1  ;;  %v1538_v40 = vpop.f32.mrb[21].mxu0  ;;  %1272 = vst [vmem:[%s2100_s8 + $0x48] sm:$0xff] %v1140_v37 }
 0x125   : > { %v1539_v41 = vadd.f32 %v1538_v40, %v1537_v38  ;;  %v1650_v42 = vpop.f32.mrb[21].mxu1  ;;  %v1540_v43 = vpop.f32.mrb[22].mxu0 }
 0x126   : > { %v1651_v44 = vadd.f32 %v1650_v42, %v1649_v39  ;;  %v1652_v45 = vpop.f32.mrb[22].mxu1  ;;  %v1541_v46 = vpop.f32.mrb[23].mxu0 }
 0x127   : > { %v1542_v47 = vadd.f32 %v1541_v46, %v1540_v43  ;;  %v1653_v48 = vpop.f32.mrb[23].mxu1 }
 0x128   : > { %v1145_v49 = vadd.f32 %v1651_v44, %v1539_v41  ;;  %v1654_v50 = vadd.f32 %v1653_v48, %v1652_v45 }
 0x12a   : > { %v1148_v51 = vadd.f32 %v1654_v50, %v1542_v47  ;;  %1273 = vst [vmem:[%s2100_s8 + $0x50] sm:$0xff] %v1145_v49 }
 0x12b   : > { %v1543_v52 = vpop.f32.mrb[24].mxu0 }
 0x12c   : > { %v1655_v53 = vpop.f32.mrb[24].mxu1  ;;  %v1544_v54 = vpop.f32.mrb[25].mxu0  ;;  %1274 = vst [vmem:[%s2100_s8 + $0x58] sm:$0xff] %v1148_v51 }
 0x12d   : > { %v1545_v55 = vadd.f32 %v1544_v54, %v1543_v52  ;;  %v1656_v56 = vpop.f32.mrb[25].mxu1  ;;  %v1546_v57 = vpop.f32.mrb[26].mxu0 }
 0x12e   : > { %v1657_v58 = vadd.f32 %v1656_v56, %v1655_v53  ;;  %v1658_v59 = vpop.f32.mrb[26].mxu1  ;;  %v1547_v60 = vpop.f32.mrb[27].mxu0 }
 0x12f   : > { %v1548_v61 = vadd.f32 %v1547_v60, %v1546_v57  ;;  %v1659_v62 = vpop.f32.mrb[27].mxu1 }
 0x130   : > { %v1153_v63 = vadd.f32 %v1657_v58, %v1545_v55  ;;  %v1660_v0 = vadd.f32 %v1659_v62, %v1658_v59 }
 0x132   : > { %v1156_v1 = vadd.f32 %v1660_v0, %v1548_v61  ;;  %1275 = vst [vmem:[%s2100_s8 + $0x60] sm:$0xff] %v1153_v63 }
 0x133   : > { %v1549_v2 = vpop.f32.mrb[28].mxu0 }
 0x134   : > { %v1661_v3 = vpop.f32.mrb[28].mxu1  ;;  %v1550_v4 = vpop.f32.mrb[29].mxu0  ;;  %1276 = vst [vmem:[%s2100_s8 + $0x68] sm:$0xff] %v1156_v1 }
 0x135   : > { %v1551_v5 = vadd.f32 %v1550_v4, %v1549_v2  ;;  %v1662_v6 = vpop.f32.mrb[29].mxu1  ;;  %v1552_v7 = vpop.f32.mrb[30].mxu0 }
 0x136   : > { %v1663_v8 = vadd.f32 %v1662_v6, %v1661_v3  ;;  %v1664_v9 = vpop.f32.mrb[30].mxu1  ;;  %v1553_v10 = vpop.f32.mrb[31].mxu0 }
 0x137   : > { %v1554_v11 = vadd.f32 %v1553_v10, %v1552_v7  ;;  %v1665_v12 = vpop.f32.mrb[31].mxu1 }
 0x138   : > { %v1161_v13 = vadd.f32 %v1663_v8, %v1551_v5  ;;  %v1666_v14 = vadd.f32 %v1665_v12, %v1664_v9 }
 0x13a   : > { %v1164_v15 = vadd.f32 %v1666_v14, %v1554_v11  ;;  %1277 = vst [vmem:[%s2100_s8 + $0x70] sm:$0xff] %v1161_v13 }
 0x13b   : > { %v1555_v16 = vpop.f32.mrb[32].mxu0 }
 0x13c   : > { %v1667_v17 = vpop.f32.mrb[32].mxu1  ;;  %v1556_v18 = vpop.f32.mrb[33].mxu0  ;;  %1278 = vst [vmem:[%s2100_s8 + $0x78] sm:$0xff] %v1164_v15 }
 0x13d   : > { %v1557_v19 = vadd.f32 %v1556_v18, %v1555_v16  ;;  %v1668_v20 = vpop.f32.mrb[33].mxu1  ;;  %v1558_v21 = vpop.f32.mrb[34].mxu0 }
 0x13e   : > { %v1669_v22 = vadd.f32 %v1668_v20, %v1667_v17  ;;  %v1670_v23 = vpop.f32.mrb[34].mxu1  ;;  %v1559_v24 = vpop.f32.mrb[35].mxu0 }
 0x13f   : > { %v1560_v25 = vadd.f32 %v1559_v24, %v1558_v21  ;;  %v1671_v26 = vpop.f32.mrb[35].mxu1 }
 0x140   : > { %v1169_v27 = vadd.f32 %v1669_v22, %v1557_v19  ;;  %v1672_v28 = vadd.f32 %v1671_v26, %v1670_v23 }
 0x142   : > { %v1172_v29 = vadd.f32 %v1672_v28, %v1560_v25  ;;  %1279 = vst [vmem:[%s2100_s8 + $0x80] sm:$0xff] %v1169_v27 }
 0x143   : > { %v1561_v30 = vpop.f32.mrb[36].mxu0 }
 0x144   : > { %v1673_v31 = vpop.f32.mrb[36].mxu1  ;;  %v1562_v32 = vpop.f32.mrb[37].mxu0  ;;  %1280 = vst [vmem:[%s2100_s8 + $0x88] sm:$0xff] %v1172_v29 }
 0x145   : > { %v1563_v33 = vadd.f32 %v1562_v32, %v1561_v30  ;;  %v1674_v34 = vpop.f32.mrb[37].mxu1  ;;  %v1564_v35 = vpop.f32.mrb[38].mxu0 }
 0x146   : > { %v1675_v36 = vadd.f32 %v1674_v34, %v1673_v31  ;;  %v1676_v37 = vpop.f32.mrb[38].mxu1  ;;  %v1565_v38 = vpop.f32.mrb[39].mxu0 }
 0x147   : > { %v1566_v39 = vadd.f32 %v1565_v38, %v1564_v35  ;;  %v1677_v40 = vpop.f32.mrb[39].mxu1 }
 0x148   : > { %v1177_v41 = vadd.f32 %v1675_v36, %v1563_v33  ;;  %v1678_v42 = vadd.f32 %v1677_v40, %v1676_v37 }
 0x14a   : > { %v1180_v43 = vadd.f32 %v1678_v42, %v1566_v39  ;;  %1281 = vst [vmem:[%s2100_s8 + $0x90] sm:$0xff] %v1177_v41 }
 0x14b   : > { %v1567_v44 = vpop.f32.mrb[40].mxu0 }
 0x14c   : > { %v1679_v45 = vpop.f32.mrb[40].mxu1  ;;  %v1568_v46 = vpop.f32.mrb[41].mxu0  ;;  %1282 = vst [vmem:[%s2100_s8 + $0x98] sm:$0xff] %v1180_v43 }
 0x14d   : > { %v1569_v47 = vadd.f32 %v1568_v46, %v1567_v44  ;;  %v1680_v48 = vpop.f32.mrb[41].mxu1  ;;  %v1570_v49 = vpop.f32.mrb[42].mxu0 }
 0x14e   : > { %v1681_v50 = vadd.f32 %v1680_v48, %v1679_v45  ;;  %v1682_v51 = vpop.f32.mrb[42].mxu1  ;;  %v1571_v52 = vpop.f32.mrb[43].mxu0 }
 0x14f   : > { %v1572_v53 = vadd.f32 %v1571_v52, %v1570_v49  ;;  %v1683_v54 = vpop.f32.mrb[43].mxu1 }
 0x150   : > { %v1185_v55 = vadd.f32 %v1681_v50, %v1569_v47  ;;  %v1684_v56 = vadd.f32 %v1683_v54, %v1682_v51 }
 0x152   : > { %v1188_v57 = vadd.f32 %v1684_v56, %v1572_v53  ;;  %1283 = vst [vmem:[%s2100_s8 + $0xa0] sm:$0xff] %v1185_v55 }
 0x153   : > { %v1573_v58 = vpop.f32.mrb[44].mxu0 }
 0x154   : > { %v1685_v59 = vpop.f32.mrb[44].mxu1  ;;  %v1574_v60 = vpop.f32.mrb[45].mxu0  ;;  %1284 = vst [vmem:[%s2100_s8 + $0xa8] sm:$0xff] %v1188_v57 }
 0x155   : > { %v1575_v61 = vadd.f32 %v1574_v60, %v1573_v58  ;;  %v1686_v62 = vpop.f32.mrb[45].mxu1  ;;  %v1576_v63 = vpop.f32.mrb[46].mxu0 }
 0x156   : > { %v1687_v0 = vadd.f32 %v1686_v62, %v1685_v59  ;;  %v1688_v1 = vpop.f32.mrb[46].mxu1  ;;  %v1577_v2 = vpop.f32.mrb[47].mxu0 }
 0x157   : > { %v1578_v3 = vadd.f32 %v1577_v2, %v1576_v63  ;;  %v1689_v4 = vpop.f32.mrb[47].mxu1 }
 0x158   : > { %v1193_v5 = vadd.f32 %v1687_v0, %v1575_v61  ;;  %v1690_v6 = vadd.f32 %v1689_v4, %v1688_v1 }
 0x15a   : > { %v1196_v7 = vadd.f32 %v1690_v6, %v1578_v3  ;;  %1285 = vst [vmem:[%s2100_s8 + $0xb0] sm:$0xff] %v1193_v5 }
 0x15b   : > { %v1579_v8 = vpop.f32.mrb[48].mxu0 }
 0x15c   : > { %v1691_v9 = vpop.f32.mrb[48].mxu1  ;;  %v1580_v10 = vpop.f32.mrb[49].mxu0  ;;  %1286 = vst [vmem:[%s2100_s8 + $0xb8] sm:$0xff] %v1196_v7 }
 0x15d   : > { %v1581_v11 = vadd.f32 %v1580_v10, %v1579_v8  ;;  %v1692_v12 = vpop.f32.mrb[49].mxu1  ;;  %v1582_v13 = vpop.f32.mrb[50].mxu0 }
 0x15e   : > { %v1693_v14 = vadd.f32 %v1692_v12, %v1691_v9  ;;  %v1694_v15 = vpop.f32.mrb[50].mxu1  ;;  %v1583_v16 = vpop.f32.mrb[51].mxu0 }
 0x15f   : > { %v1584_v17 = vadd.f32 %v1583_v16, %v1582_v13  ;;  %v1695_v18 = vpop.f32.mrb[51].mxu1 }
 0x160   : > { %v1201_v19 = vadd.f32 %v1693_v14, %v1581_v11  ;;  %v1696_v20 = vadd.f32 %v1695_v18, %v1694_v15 }
 0x162   : > { %v1204_v21 = vadd.f32 %v1696_v20, %v1584_v17  ;;  %1287 = vst [vmem:[%s2100_s8 + $0xc0] sm:$0xff] %v1201_v19 }
 0x163   : > { %v1585_v22 = vpop.f32.mrb[52].mxu0 }
 0x164   : > { %v1697_v23 = vpop.f32.mrb[52].mxu1  ;;  %v1586_v24 = vpop.f32.mrb[53].mxu0  ;;  %1288 = vst [vmem:[%s2100_s8 + $0xc8] sm:$0xff] %v1204_v21 }
 0x165   : > { %v1587_v25 = vadd.f32 %v1586_v24, %v1585_v22  ;;  %v1698_v26 = vpop.f32.mrb[53].mxu1  ;;  %v1588_v27 = vpop.f32.mrb[54].mxu0 }
 0x166   : > { %v1699_v28 = vadd.f32 %v1698_v26, %v1697_v23  ;;  %v1700_v29 = vpop.f32.mrb[54].mxu1  ;;  %v1589_v30 = vpop.f32.mrb[55].mxu0 }
 0x167   : > { %v1590_v31 = vadd.f32 %v1589_v30, %v1588_v27  ;;  %v1701_v32 = vpop.f32.mrb[55].mxu1 }
 0x168   : > { %v1209_v33 = vadd.f32 %v1699_v28, %v1587_v25  ;;  %v1702_v34 = vadd.f32 %v1701_v32, %v1700_v29 }
 0x16a   : > { %v1212_v35 = vadd.f32 %v1702_v34, %v1590_v31  ;;  %1289 = vst [vmem:[%s2100_s8 + $0xd0] sm:$0xff] %v1209_v33 }
 0x16b   : > { %v1591_v36 = vpop.f32.mrb[56].mxu0 }
 0x16c   : > { %v1703_v37 = vpop.f32.mrb[56].mxu1  ;;  %v1592_v38 = vpop.f32.mrb[57].mxu0  ;;  %1290 = vst [vmem:[%s2100_s8 + $0xd8] sm:$0xff] %v1212_v35 }
 0x16d   : > { %v1593_v39 = vadd.f32 %v1592_v38, %v1591_v36  ;;  %v1704_v40 = vpop.f32.mrb[57].mxu1  ;;  %v1594_v41 = vpop.f32.mrb[58].mxu0 }
 0x16e   : > { %v1705_v42 = vadd.f32 %v1704_v40, %v1703_v37  ;;  %v1706_v43 = vpop.f32.mrb[58].mxu1  ;;  %v1595_v44 = vpop.f32.mrb[59].mxu0 }
 0x16f   : > { %v1596_v45 = vadd.f32 %v1595_v44, %v1594_v41  ;;  %v1707_v46 = vpop.f32.mrb[59].mxu1 }
 0x170   : > { %v1217_v47 = vadd.f32 %v1705_v42, %v1593_v39  ;;  %v1708_v48 = vadd.f32 %v1707_v46, %v1706_v43 }
 0x172   : > { %v1220_v49 = vadd.f32 %v1708_v48, %v1596_v45  ;;  %1291 = vst [vmem:[%s2100_s8 + $0xe0] sm:$0xff] %v1217_v47 }
 0x173   : > { %v1597_v50 = vpop.f32.mrb[60].mxu0 }
 0x174   : > { %v1709_v51 = vpop.f32.mrb[60].mxu1  ;;  %v1598_v52 = vpop.f32.mrb[61].mxu0  ;;  %1292 = vst [vmem:[%s2100_s8 + $0xe8] sm:$0xff] %v1220_v49 }
 0x175   : > { %v1599_v53 = vadd.f32 %v1598_v52, %v1597_v50  ;;  %v1710_v54 = vpop.f32.mrb[61].mxu1  ;;  %v1600_v55 = vpop.f32.mrb[62].mxu0 }
 0x176   : > { %v1711_v56 = vadd.f32 %v1710_v54, %v1709_v51  ;;  %v1712_v57 = vpop.f32.mrb[62].mxu1  ;;  %v1601_v58 = vpop.f32.mrb[63].mxu0 }
 0x177   : > { %v1602_v59 = vadd.f32 %v1601_v58, %v1600_v55  ;;  %v1713_v60 = vpop.f32.mrb[63].mxu1 }
 0x178   : > { %v1225_v61 = vadd.f32 %v1711_v56, %v1599_v53  ;;  %v1714_v62 = vadd.f32 %v1713_v60, %v1712_v57 }
 0x17a   : > { %v1228_v63 = vadd.f32 %v1714_v62, %v1602_v59  ;;  %1293 = vst [vmem:[%s2100_s8 + $0xf0] sm:$0xff] %v1225_v61 }
 0x17c   : > { %1294 = vst [vmem:[%s2100_s8 + $0xf8] sm:$0xff] %v1228_v63 }
 0x17d PF: > { %s12_s11 = sadd.s32 1, %s1890_s11   ;;  %s2146_s9 = smov %s1886_s10 }
 0x17e   : > { %p9_p5 = scmp.ge.s32.totalorder %s12_s11, 4   ;;  %s2147_s10 = smov %s2149_s12 }
 0x180   :  { %11 = sbr.rel (!%p9_p5) target bundleno = 2 (0x2), region = 65 }

// kernel: _gcn_forward_padded.2
= control target key start
LH: loop header
LB: loop body
LE: loop exit
PB: predicated region body
PF: predicated region fallthrough
CT: control target
= control target key end

     0   :  { %9 = vsyncpa [#allocation4], 0  ;;  %s3208_s0 = inlined_call_operand.hbm [shape: bf16[512,512], index: 0, kind: input, shape index: {}]   ;;  %s3209_s1 = inlined_call_operand.vmem [shape: bf16[512,128], index: 1, kind: input, shape index: {}]   ;;  %s3210_s2 = inlined_call_operand.vmem [shape: bf16[128,128], index: 2, kind: input, shape index: {}]   ;;  %s3211_s3 = inlined_call_operand.vmem [shape: f32[1,128], index: 3, kind: input, shape index: {}]   ;;  %s3212_s4 = inlined_call_operand.vmem [shape: bf16[512,128], index: 4, kind: output, shape index: {}]  }
   0x1   :  { %11 = vsyncpa [#allocation4 + $0x1], 0  ;;  %s2820_s15 = smov 0   ;;  %s2822_s16 = smov 0  }
   0x2   :  { %s2824_s17 = smov 0   ;;  %s2826_s18 = smov 0  }
   0x3   :  { %s2828_s19 = smov 0   ;;  %s2830_s20 = smov 0  }
   0x4 LB: > { %s1924_s21 = sadd.s32 4294967295, %s2790_s20   ;;  %s29_s22 = sadd.s32 1, %s2786_s19  ;;  %s2790_s20 = sphi %s2830_s20, %s17_s20   ;;  %s2786_s19 = sphi %s2828_s19, %s3220_s19   ;;  %s2782_s18 = sphi %s2826_s18, %s3219_s18   ;;  %s2778_s17 = sphi %s2824_s17, %s3218_s17   ;;  %s2774_s16 = sphi %s2822_s16, %s3217_s16   ;;  %s2770_s15 = sphi %s2820_s15, %s3216_s15  }
   0x5   : > { %p31_p0 = scmp.ge.s32.totalorder %s29_s22, 2  ;;  %s38_s23 = sadd.s32 1, %s2778_s17 }
   0x6   : > { %p45_p1 = scmp.ne.s32.totalorder %s2778_s17, %s2774_s16  ;;  %p46_p2 = scmp.eq.s32.totalorder %s2790_s20, 0 }
   0x7   : > { %s3222_s22 = smov (%p31_p0, %s29_s22), 0  ;;  %p51_p4 = scmp.ne.s32.totalorder %s2774_s16, %s2770_s15 }
   0x8   : > { %p2856_p3 = por %p46_p2, %p45_p1  ;;  %s33_s25 = ssub.s32 %s2786_s19, %s3222_s22 }
   0x9   : > { %p52_p5 = scmp.eq.s32.totalorder %s1924_s21, 0  ;;  %p36_p6 = scmp.eq.s32.totalorder %s33_s25, 0 }
   0xa   : > { %p2523_p8 = scmp.lt.s32.totalorder %s2790_s20, 2  ;;  %s184_s28 = sand.u32 1, %s2778_s17  }
   0xb   : > { %p2863_p7 = por %p52_p5, %p51_p4  ;;  %s2077_s29 = sshll.u32 %s2786_s19, 13 }
   0xc   : > { %s2869_s27 = scalar_select %p36_p6, %s2778_s17, %s38_s23  }
   0xd   : > { %s1929_s30 = sshll.u32 %s184_s28, 9  ;;  %s2876_s7 = scalar_lea.hbm %s3208_s0, %s2077_s29 }
   0xe   : > { %s188_s8 = scalar_lea.vmem [#allocation3], %s1929_s30  ;;  %p2880_p9 = pnand %p2523_p8, %p2856_p3 }
   0xf   : > { %s198_s9 = sshll.u32 %s188_s8, 4  ;;  %s2886_s11 = scalar_lea.sflag [#allocation4], %s184_s28  ;;  %s2884_s9 = int_to_ptr.vmem [resolvable:$true] %s198_s9 }
  0x10   : > { %s2710_s12 = scalar_lea.hbm %s2876_s7, 8192  ;;  %p2712_p11 = pneg %p2880_p9 }
  0x11   : > { %p2711_p10 = scmp.ne.s32.totalorder %s2876_s7, %s2710_s12  ;;  %s2715_s15 = scalar_lea.hbm %s3208_s0, 16384 }
  0x12   : > { %p2716_p0 = scmp.lt.u32.totalorder %s2876_s7, %s3208_s0  ;;  %p2717_p1 = scmp.lt.u32.totalorder %s2715_s15, %s2710_s12 }
  0x13   : > { %p2713_p12 = pnand %p2712_p11, %p2711_p10  ;;  %p2719_p3 = scmp.lt.u32.totalorder %s2710_s12, %s2876_s7 }
  0x14   : > { %p2718_p2 = por %p2717_p1, %p2716_p0 }
  0x15   : > { %p2714_p13 = pneg %p2713_p12 }
  0x16   : > { %p2720_p4 = por %p2719_p3, %p2718_p2 }
  0x18   : > { %p2721_p5 = pnand %p2720_p4, %p2714_p13 }
  0x1a   : > { %2724 = shalt.err (!%p2721_p5)
}
  0x1b   : > { %s2725_s24 = scalar_lea.vmem %s2884_s9, 8192  ;;  %s2792_s25 = smov [#allocation3]  }
  0x1c   : > { %p2726_p6 = scmp.ne.s32.totalorder %s2884_s9, %s2725_s24  ;;  %s2730_s28 = sshll.u32 %s2792_s25, 4  ;;  %s2731_s28 = int_to_ptr.vmem [resolvable:$false] %s2730_s28 }
  0x1d   : > { %s2732_s29 = scalar_lea.vmem %s2731_s28, 16384  ;;  %p2733_p12 = scmp.lt.s32.totalorder %s2884_s9, %s2731_s28 }
  0x1e   : > { %p2728_p8 = pnand %p2726_p6, %p2712_p11  ;;  %p2734_p0 = scmp.lt.s32.totalorder %s2732_s29, %s2725_s24 }
  0x20   : > { %p2729_p10 = pneg %p2728_p8  ;;  %p2735_p1 = por %p2734_p0, %p2733_p12 }
  0x22   : > { %p2736_p2 = pnand %p2735_p1, %p2729_p10 }
  0x24   : > { %2739 = shalt.err (!%p2736_p2)
}
  0x25   : > { %s2793_s30 = smov 256   ;;  %s2794_s5 = smov 16  }
  0x26   : > { %2522 = dma.hbm_to_vmem [thread:$0]  (!%p2880_p9), %s2876_s7, 8192, %s2884_s9, %s2886_s11, %s2793_s30, %s2793_s30, %s2794_s5  }
  0x27   : > { %p1933_p11 = scmp.ge.s32.totalorder %s2790_s20, 1  ;;  %p206_p13 = scmp.lt.s32.totalorder %s2790_s20, 3 }
  0x29   : > { %p207_p3 = pnand %p1933_p11, %p206_p13 }
  0x2a   : > { %s212_s6 = sand.u32 (!%p207_p3), 1, %s2774_s16  }
  0x2b   : > { %210 = sbr.rel (%p207_p3) target bundleno = 679 (0x2a7), region = 36  ;;  %s1934_s8 = sshll.u32 (!%p207_p3), %s212_s6, 9 }
  0x2c   : > { %s213_s12 = scalar_lea.sflag (!%p207_p3), [#allocation4], %s212_s6  ;;  %s2917_s13 = scalar_lea.vmem (!%p207_p3), [#allocation3], %s1934_s8 }
  0x32   : > { %2765 = dma.done.wait (%p2863_p7), %s213_s12, 8192  }
  0x33   : > { %2767 = vsyncadd (%p2863_p7), %s213_s12, 4294959104  ;;  %v2574_v0 = vld [vmem:[%s3209_s1 + $0x40] sm:$0xff]   ;;  %v2576_v2 = vld [vmem:[%s3209_s1 + $0x48] sm:$0xff]  }
  0x34   : > { %v2575_v1 = vld [vmem:[%s3209_s1] sm:$0xff]   ;;  %2501 = vmatprep.subr.bf16.mxu1 %v2574_v0  ;;  %2205 = vmatprep.subr.bf16.mxu0 %v2574_v0  ;;  %v2577_v3 = vld [vmem:[%s3209_s1 + $0x8] sm:$0xff]   ;;  %v2578_v4 = vld [vmem:[%s3209_s1 + $0x50] sm:$0xff]  }
  0x35   : > { %2509 = vmatpush3.bf16.msra.mxu1 %v2575_v1  ;;  %2206 = vmatpush3.bf16.msra.mxu0 %v2575_v1  ;;  %v2579_v5 = vld [vmem:[%s3209_s1 + $0x10] sm:$0xff]   ;;  %v2580_v6 = vld [vmem:[%s3209_s1 + $0x58] sm:$0xff]   ;;  %v2582_v8 = vld [vmem:[%s3209_s1 + $0x60] sm:$0xff]  }
  0x36   : > { %2502 = vmatprep.subr.bf16.mxu1 %v2576_v2  ;;  %2207 = vmatprep.subr.bf16.mxu0 %v2576_v2  ;;  %v2581_v7 = vld [vmem:[%s3209_s1 + $0x18] sm:$0xff]   ;;  %v2583_v9 = vld [vmem:[%s3209_s1 + $0x20] sm:$0xff]   ;;  %v2584_v10 = vld [vmem:[%s3209_s1 + $0x68] sm:$0xff]  }
  0x37   : > { %v2592_v11 = vld [vmem:[%s2917_s13 + $0x184] ss:$16 sps:$4 sm:$0xff]   ;;  %v2585_v12 = vld [vmem:[%s3209_s1 + $0x28] sm:$0xff]   ;;  %v2588_v15 = vld [vmem:[%s3209_s1 + $0x78] sm:$0xff]  }
  0x38   : > { %1097 = vmatprep.mubr.bf16.mxu1 %v2592_v11  ;;  %v2586_v13 = vld [vmem:[%s3209_s1 + $0x70] sm:$0xff]   ;;  %v2589_v16 = vld [vmem:[%s3209_s1 + $0x38] sm:$0xff]   ;;  %v2593_v17 = vld [vmem:[%s3209_s1 + $0xc0] sm:$0xff]  }
  0x39   : > { %2510 = vmatpush3.bf16.msra.mxu1 %v2577_v3  ;;  %2208 = vmatpush3.bf16.msra.mxu0 %v2577_v3  ;;  %v2587_v14 = vld [vmem:[%s3209_s1 + $0x30] sm:$0xff]   ;;  %v2594_v19 = vld [vmem:[%s3209_s1 + $0x80] sm:$0xff]   ;;  %v2595_v21 = vld [vmem:[%s3209_s1 + $0xc8] sm:$0xff]  }
  0x3a   : > { %2503 = vmatprep.subr.bf16.mxu1 %v2578_v4  ;;  %2209 = vmatprep.subr.bf16.mxu0 %v2578_v4  ;;  %v2590_v18 = vld [vmem:[%s2917_s13 + $0x180] ss:$16 sps:$4 sm:$0xff]   ;;  %v2597_v20 = vld [vmem:[%s2917_s13 + $0x1a4] ss:$16 sps:$4 sm:$0xff]   ;;  %v2596_v22 = vld [vmem:[%s3209_s1 + $0x88] sm:$0xff]  }
  0x3b   : > { %v2599_v23 = vld [vmem:[%s2917_s13 + $0x1a0] ss:$16 sps:$4 sm:$0xff]   ;;  %v2620_v27 = vld [vmem:[%s2917_s13 + $0x4] ss:$16 sps:$4 sm:$0xff]   ;;  %v2602_v28 = vld [vmem:[%s3209_s1 + $0xd8] sm:$0xff]  }
  0x3c   : > { %v2600_v24 = vld [vmem:[%s3209_s1 + $0xd0] sm:$0xff]   ;;  %1001 = vmatprep.mubr.bf16.mxu0 %v2620_v27  ;;  %v2603_v31 = vld [vmem:[%s3209_s1 + $0x98] sm:$0xff]   ;;  %v2607_v33 = vld [vmem:[%s3209_s1 + $0xe0] sm:$0xff]  }
  0x3d   : > { %2511 = vmatpush3.bf16.msra.mxu1 %v2579_v5  ;;  %2210 = vmatpush3.bf16.msra.mxu0 %v2579_v5  ;;  %v2601_v25 = vld [vmem:[%s3209_s1 + $0x90] sm:$0xff]   ;;  %v2608_v36 = vld [vmem:[%s3209_s1 + $0xa0] sm:$0xff]   ;;  %v2609_v38 = vld [vmem:[%s3209_s1 + $0xe8] sm:$0xff]  }
  0x3e   : > { %2504 = vmatprep.subr.bf16.mxu1 %v2580_v6  ;;  %2211 = vmatprep.subr.bf16.mxu0 %v2580_v6  ;;  %v2618_v26 = vld [vmem:[%s2917_s13] ss:$16 sps:$4 sm:$0xff]   ;;  %v2604_v29 = vld [vmem:[%s2917_s13 + $0x1c4] ss:$16 sps:$4 sm:$0xff]   ;;  %v2610_v39 = vld [vmem:[%s3209_s1 + $0xa8] sm:$0xff]  }
  0x3f   : > { %v2624_v30 = vld [vmem:[%s2917_s13 + $0x24] ss:$16 sps:$4 sm:$0xff]   ;;  %v2606_v32 = vld [vmem:[%s2917_s13 + $0x1c0] ss:$16 sps:$4 sm:$0xff]   ;;  %v2623_v45 = vld [vmem:[%s2917_s13 + $0xc] ss:$16 sps:$4 sm:$0xff]  }
  0x40   : > { %v2628_v34 = vld [vmem:[%s2917_s13 + $0x20] ss:$16 sps:$4 sm:$0xff]   ;;  %v2630_v35 = vld [vmem:[%s2917_s13 + $0x44] ss:$16 sps:$4 sm:$0xff]   ;;  %v2616_v46 = vld [vmem:[%s3209_s1 + $0xf8] sm:$0xff]  }
  0x41   : > { %2512 = vmatpush3.bf16.msra.mxu1 %v2581_v7  ;;  %2212 = vmatpush3.bf16.msra.mxu0 %v2581_v7  ;;  %v2611_v37 = vld [vmem:[%s2917_s13 + $0x1e4] ss:$16 sps:$4 sm:$0xff]   ;;  %v2613_v40 = vld [vmem:[%s2917_s13 + $0x1e0] ss:$16 sps:$4 sm:$0xff]   ;;  %v2617_v47 = vld [vmem:[%s3209_s1 + $0xb8] sm:$0xff]  }
  0x42   : > { %2505 = vmatprep.subr.bf16.mxu1 %v2582_v8  ;;  %2213 = vmatprep.subr.bf16.mxu0 %v2582_v8  ;;  %v2614_v41 = vld [vmem:[%s3209_s1 + $0xf0] sm:$0xff]   ;;  %v2621_v48 = vld [vmem:[%s2917_s13 + $0x8] ss:$16 sps:$4 sm:$0xff]   ;;  %v2626_v51 = vld [vmem:[%s2917_s13 + $0x2c] ss:$16 sps:$4 sm:$0xff]  }
  0x43   : > { %v2634_v42 = vld [vmem:[%s2917_s13 + $0x40] ss:$16 sps:$4 sm:$0xff]   ;;  %v2636_v43 = vld [vmem:[%s2917_s13 + $0x64] ss:$16 sps:$4 sm:$0xff]   ;;  %v2629_v53 = vld [vmem:[%s2917_s13 + $0x28] ss:$16 sps:$4 sm:$0xff]  }
  0x44   : > { %v2615_v44 = vld [vmem:[%s3209_s1 + $0xb0] sm:$0xff]   ;;  %v2632_v55 = vld [vmem:[%s2917_s13 + $0x4c] ss:$16 sps:$4 sm:$0xff]   ;;  %v2635_v57 = vld [vmem:[%s2917_s13 + $0x48] ss:$16 sps:$4 sm:$0xff]  }
  0x45   : > { %2513 = vmatpush3.bf16.msra.mxu1 %v2583_v9  ;;  %2214 = vmatpush3.bf16.msra.mxu0 %v2583_v9  ;;  %v2640_v49 = vld [vmem:[%s2917_s13 + $0x60] ss:$16 sps:$4 sm:$0xff]   ;;  %v2642_v50 = vld [vmem:[%s2917_s13 + $0x84] ss:$16 sps:$4 sm:$0xff]   ;;  %v2638_v59 = vld [vmem:[%s2917_s13 + $0x6c] ss:$16 sps:$4 sm:$0xff]  }
  0x46   : > { %2506 = vmatprep.subr.bf16.mxu1 %v2584_v10  ;;  %2215 = vmatprep.subr.bf16.mxu0 %v2584_v10  ;;  %v2646_v52 = vld [vmem:[%s2917_s13 + $0x80] ss:$16 sps:$4 sm:$0xff]   ;;  %v2648_v54 = vld [vmem:[%s2917_s13 + $0xa4] ss:$16 sps:$4 sm:$0xff]   ;;  %v2641_v61 = vld [vmem:[%s2917_s13 + $0x68] ss:$16 sps:$4 sm:$0xff]  }
  0x47   : > { %v2652_v56 = vld [vmem:[%s2917_s13 + $0xa0] ss:$16 sps:$4 sm:$0xff]   ;;  %v2654_v58 = vld [vmem:[%s2917_s13 + $0xc4] ss:$16 sps:$4 sm:$0xff]   ;;  %v2644_v63 = vld [vmem:[%s2917_s13 + $0x8c] ss:$16 sps:$4 sm:$0xff]  }
  0x48   : > { %v2658_v60 = vld [vmem:[%s2917_s13 + $0xc0] ss:$16 sps:$4 sm:$0xff]   ;;  %v2660_v62 = vld [vmem:[%s2917_s13 + $0xe4] ss:$16 sps:$4 sm:$0xff]   ;;  %v2647_v1 = vld [vmem:[%s2917_s13 + $0x88] ss:$16 sps:$4 sm:$0xff]  }
  0x49   : > { %2514 = vmatpush3.bf16.msra.mxu1 %v2585_v12  ;;  %2216 = vmatpush3.bf16.msra.mxu0 %v2585_v12  ;;  %v2664_v0 = vld [vmem:[%s2917_s13 + $0xe0] ss:$16 sps:$4 sm:$0xff]   ;;  %v2666_v2 = vld [vmem:[%s2917_s13 + $0x104] ss:$16 sps:$4 sm:$0xff]   ;;  %v2650_v3 = vld [vmem:[%s2917_s13 + $0xac] ss:$16 sps:$4 sm:$0xff]  }
  0x4a   : > { %2507 = vmatprep.subr.bf16.mxu1 %v2586_v13  ;;  %2217 = vmatprep.subr.bf16.mxu0 %v2586_v13  ;;  %v2670_v4 = vld [vmem:[%s2917_s13 + $0x100] ss:$16 sps:$4 sm:$0xff]   ;;  %v2653_v5 = vld [vmem:[%s2917_s13 + $0xa8] ss:$16 sps:$4 sm:$0xff]   ;;  %v2672_v6 = vld [vmem:[%s2917_s13 + $0x124] ss:$16 sps:$4 sm:$0xff]  }
  0x4b   : > { %v2656_v7 = vld [vmem:[%s2917_s13 + $0xcc] ss:$16 sps:$4 sm:$0xff]   ;;  %v2676_v8 = vld [vmem:[%s2917_s13 + $0x120] ss:$16 sps:$4 sm:$0xff]   ;;  %v2659_v9 = vld [vmem:[%s2917_s13 + $0xc8] ss:$16 sps:$4 sm:$0xff]  }
  0x4c   : > { %v2678_v10 = vld [vmem:[%s2917_s13 + $0x144] ss:$16 sps:$4 sm:$0xff]   ;;  %v2662_v11 = vld [vmem:[%s2917_s13 + $0xec] ss:$16 sps:$4 sm:$0xff]   ;;  %v2682_v12 = vld [vmem:[%s2917_s13 + $0x140] ss:$16 sps:$4 sm:$0xff]  }
  0x4d   : > { %2515 = vmatpush3.bf16.msra.mxu1 %v2587_v14  ;;  %2218 = vmatpush3.bf16.msra.mxu0 %v2587_v14  ;;  %v2665_v13 = vld [vmem:[%s2917_s13 + $0xe8] ss:$16 sps:$4 sm:$0xff]   ;;  %v2684_v14 = vld [vmem:[%s2917_s13 + $0x164] ss:$16 sps:$4 sm:$0xff]  }
  0x4e   : > { %2508 = vmatprep.subr.bf16.mxu1 %v2588_v15  ;;  %2219 = vmatprep.subr.bf16.mxu0 %v2588_v15  ;;  %v2668_v15 = vld [vmem:[%s2917_s13 + $0x10c] ss:$16 sps:$4 sm:$0xff]   ;;  %v2689_v27 = vld [vmem:[%s2917_s13 + $0x168] ss:$16 sps:$4 sm:$0xff]  }
  0x51   : > { %2516 = vmatpush3.bf16.msra.mxu1 %v2589_v16  ;;  %2220 = vmatpush3.bf16.msra.mxu0 %v2589_v16  ;;  %v2688_v16 = vld [vmem:[%s2917_s13 + $0x160] ss:$16 sps:$4 sm:$0xff]  }
  0x52   : > { %2317 = vmatprep.subr.bf16.mxu1 %v2593_v17  ;;  %v2671_v17 = vld [vmem:[%s2917_s13 + $0x108] ss:$16 sps:$4 sm:$0xff]  }
  0x54   : > { %1098 = vmatmul.mubr.bf16.vlgmr.msra.gmra.mrb[0].mxu1 %v2590_v18  ;;  %1002 = vmatmul.mubr.bf16.vlgmr.msra.gmra.mrb[0].mxu0 %v2618_v26  ;;  %v2674_v18 = vld [vmem:[%s2917_s13 + $0x12c] ss:$16 sps:$4 sm:$0xff]  }
  0x55   : > { %2318 = vmatpush3.bf16.msra.mxu1 %v2594_v19  ;;  %1105 = vmatprep.mubr.bf16.mxu1 %v2597_v20  ;;  %v2702_v19 = vld [vmem:[%s3210_s2] sm:$0xff]   ;;  %v2677_v20 = vld [vmem:[%s2917_s13 + $0x128] ss:$16 sps:$4 sm:$0xff]  }
  0x56   : > { %2319 = vmatprep.subr.bf16.mxu1 %v2595_v21  ;;  %1009 = vmatprep.mubr.bf16.mxu0 %v2624_v30  ;;  %v2680_v21 = vld [vmem:[%s2917_s13 + $0x14c] ss:$16 sps:$4 sm:$0xff]  }
  0x57   : > { %2453 = vmatprep.subr.bf16.mxu0 %v2702_v19  ;;  %v2705_v26 = vld [vmem:[%s3210_s2 + $0x18] sm:$0xff]   ;;  %v2707_v30 = vld [vmem:[%s3210_s2 + $0x28] sm:$0xff]  }
  0x58   : > { %2454 = vmatpush3.bf16.msra.mxu0 %v2702_v19 }
  0x59   : > { %2320 = vmatpush3.bf16.msra.mxu1 %v2596_v22  ;;  %v2703_v22 = vld [vmem:[%s3210_s2 + $0x8] sm:$0xff]  }
  0x5a   : > { %2321 = vmatprep.subr.bf16.mxu1 %v2600_v24  ;;  %2455 = vmatprep.subr.bf16.mxu0 %v2703_v22  ;;  %v2686_v24 = vld [vmem:[%s2917_s13 + $0x16c] ss:$16 sps:$4 sm:$0xff]  }
  0x5c   : > { %1106 = vmatmul.mubr.bf16.gmra.mrb[4].mxu1 %v2599_v23  ;;  %1010 = vmatmul.mubr.bf16.gmra.mrb[4].mxu0 %v2628_v34  ;;  %v2683_v23 = vld [vmem:[%s2917_s13 + $0x148] ss:$16 sps:$4 sm:$0xff]  }
  0x5d   : > { %2322 = vmatpush3.bf16.msra.mxu1 %v2601_v25  ;;  %1113 = vmatprep.mubr.bf16.mxu1 %v2604_v29  ;;  %v2704_v25 = vld [vmem:[%s3210_s2 + $0x10] sm:$0xff]   ;;  %v2706_v29 = vld [vmem:[%s3210_s2 + $0x20] sm:$0xff]   ;;  %v2709_v34 = vld [vmem:[%s3210_s2 + $0x38] sm:$0xff]  }
  0x5e   : > { %2323 = vmatprep.subr.bf16.mxu1 %v2602_v28  ;;  %1017 = vmatprep.mubr.bf16.mxu0 %v2630_v35  ;;  %v2690_v28 = vld [vmem:[%s2917_s13 + $0x18c] ss:$16 sps:$4 sm:$0xff]   ;;  %v2695_v35 = vld [vmem:[%s2917_s13 + $0x1a8] ss:$16 sps:$4 sm:$0xff]  }
  0x5f   : > { %2456 = vmatpush3.bf16.msra.mxu0 %v2703_v22 }
  0x60   : > { %2457 = vmatprep.subr.bf16.mxu0 %v2704_v25 }
  0x61   : > { %2324 = vmatpush3.bf16.msra.mxu1 %v2603_v31  ;;  %v2692_v31 = vld [vmem:[%s2917_s13 + $0x188] ss:$16 sps:$4 sm:$0xff]  }
  0x62   : > { %2325 = vmatprep.subr.bf16.mxu1 %v2607_v33  ;;  %v2708_v33 = vld [vmem:[%s3210_s2 + $0x30] sm:$0xff]  }
  0x63   : > { %2458 = vmatpush3.bf16.msra.mxu0 %v2704_v25 }
  0x64   : > { %1114 = vmatmul.mubr.bf16.gmra.mrb[8].mxu1 %v2606_v32  ;;  %1018 = vmatmul.mubr.bf16.gmra.mrb[8].mxu0 %v2634_v42  ;;  %v2693_v32 = vld [vmem:[%s2917_s13 + $0x1ac] ss:$16 sps:$4 sm:$0xff]  }
  0x65   : > { %2326 = vmatpush3.bf16.msra.mxu1 %v2608_v36  ;;  %1121 = vmatprep.mubr.bf16.mxu1 %v2611_v37  ;;  %v2696_v36 = vld [vmem:[%s2917_s13 + $0x1cc] ss:$16 sps:$4 sm:$0xff]   ;;  %v2698_v37 = vld [vmem:[%s2917_s13 + $0x1c8] ss:$16 sps:$4 sm:$0xff]  }
  0x66   : > { %2327 = vmatprep.subr.bf16.mxu1 %v2609_v38  ;;  %1025 = vmatprep.mubr.bf16.mxu0 %v2636_v43  ;;  %v2699_v38 = vld [vmem:[%s2917_s13 + $0x1ec] ss:$16 sps:$4 sm:$0xff]  }
  0x67   : > { %2459 = vmatprep.subr.bf16.mxu0 %v2705_v26 }
  0x68   : > { %2460 = vmatpush3.bf16.msra.mxu0 %v2705_v26 }
  0x69   : > { %2328 = vmatpush3.bf16.msra.mxu1 %v2610_v39  ;;  %2461 = vmatprep.subr.bf16.mxu0 %v2706_v29  ;;  %v2701_v39 = vld [vmem:[%s2917_s13 + $0x1e8] ss:$16 sps:$4 sm:$0xff]   ;;  %s1935_s13 = sshll.u32 %s2782_s18, 5 }
  0x6a   : > { %2329 = vmatprep.subr.bf16.mxu1 %v2614_v41  ;;  %p255_p7 = scmp.lt.s32.totalorder %s1935_s13, 63 }
  0x6c   : > { %1122 = vmatmul.mubr.bf16.gmra.mrb[12].mxu1 %v2613_v40  ;;  %1026 = vmatmul.mubr.bf16.gmra.mrb[12].mxu0 %v2640_v49  ;;  %s3224_s13 = smov (!%p255_p7, %s1935_s13), 63 }
  0x6d   : > { %2330 = vmatpush3.bf16.msra.mxu1 %v2615_v44  ;;  %1162 = vmatprep.mubr.bf16.mxu1 %v2623_v45  ;;  %s1936_s25 = sshll.u32 %s3224_s13, 2 }
  0x6e   : > { %2331 = vmatprep.subr.bf16.mxu1 %v2616_v46  ;;  %1033 = vmatprep.mubr.bf16.mxu0 %v2642_v50  ;;  %s3143_s29 = scalar_lea.vmem %s3212_s4, %s1936_s25 }
  0x6f   : > { %2462 = vmatpush3.bf16.msra.mxu0 %v2706_v29 }
  0x70   : > { %2463 = vmatprep.subr.bf16.mxu0 %v2707_v30 }
  0x71   : > { %2332 = vmatpush3.bf16.msra.mxu1 %v2617_v47 }
  0x73   : > { %2464 = vmatpush3.bf16.msra.mxu0 %v2707_v30 }
  0x74   : > { %1163 = vmatmul.mubr.bf16.vlgmr.msra.gmra.mrb[16].mxu1 %v2621_v48  ;;  %1034 = vmatmul.mubr.bf16.gmra.mrb[16].mxu0 %v2646_v52 }
  0x75   : > { %1170 = vmatprep.mubr.bf16.mxu1 %v2626_v51  ;;  %1041 = vmatprep.mubr.bf16.mxu0 %v2648_v54 }
  0x76   : > { %2465 = vmatprep.subr.bf16.mxu0 %v2708_v33 }
  0x77   : > { %2466 = vmatpush3.bf16.msra.mxu0 %v2708_v33 }
  0x78   : > { %2467 = vmatprep.subr.bf16.mxu0 %v2709_v34 }
  0x7b   : > { %2468 = vmatpush3.bf16.msra.mxu0 %v2709_v34 }
  0x7c   : > { %1171 = vmatmul.mubr.bf16.gmra.mrb[20].mxu1 %v2629_v53  ;;  %1042 = vmatmul.mubr.bf16.gmra.mrb[20].mxu0 %v2652_v56 }
  0x7d   : > { %1178 = vmatprep.mubr.bf16.mxu1 %v2632_v55  ;;  %1049 = vmatprep.mubr.bf16.mxu0 %v2654_v58 }
  0x84   : > { %1179 = vmatmul.mubr.bf16.gmra.mrb[24].mxu1 %v2635_v57  ;;  %1050 = vmatmul.mubr.bf16.gmra.mrb[24].mxu0 %v2658_v60 }
  0x85   : > { %1186 = vmatprep.mubr.bf16.mxu1 %v2638_v59  ;;  %1057 = vmatprep.mubr.bf16.mxu0 %v2660_v62 }
  0x8c   : > { %1187 = vmatmul.mubr.bf16.gmra.mrb[28].mxu1 %v2641_v61  ;;  %1058 = vmatmul.mubr.bf16.gmra.mrb[28].mxu0 %v2664_v0 }
  0x8d   : > { %1194 = vmatprep.mubr.bf16.mxu1 %v2644_v63  ;;  %1065 = vmatprep.mubr.bf16.mxu0 %v2666_v2 }
  0x94   : > { %1195 = vmatmul.mubr.bf16.gmra.mrb[32].mxu1 %v2647_v1  ;;  %1066 = vmatmul.mubr.bf16.gmra.mrb[32].mxu0 %v2670_v4 }
  0x95   : > { %1202 = vmatprep.mubr.bf16.mxu1 %v2650_v3  ;;  %1073 = vmatprep.mubr.bf16.mxu0 %v2672_v6 }
  0x9c   : > { %1203 = vmatmul.mubr.bf16.gmra.mrb[36].mxu1 %v2653_v5  ;;  %1074 = vmatmul.mubr.bf16.gmra.mrb[36].mxu0 %v2676_v8 }
  0x9d   : > { %1210 = vmatprep.mubr.bf16.mxu1 %v2656_v7  ;;  %1081 = vmatprep.mubr.bf16.mxu0 %v2678_v10 }
  0xa4   : > { %1211 = vmatmul.mubr.bf16.gmra.mrb[40].mxu1 %v2659_v9  ;;  %1082 = vmatmul.mubr.bf16.gmra.mrb[40].mxu0 %v2682_v12 }
  0xa5   : > { %1218 = vmatprep.mubr.bf16.mxu1 %v2662_v11  ;;  %1089 = vmatprep.mubr.bf16.mxu0 %v2684_v14 }
  0xac   : > { %1219 = vmatmul.mubr.bf16.gmra.mrb[44].mxu1 %v2665_v13  ;;  %1090 = vmatmul.mubr.bf16.gmra.mrb[44].mxu0 %v2688_v16 }
  0xad   : > { %1226 = vmatprep.mubr.bf16.mxu1 %v2668_v15 }
  0xb4   : > { %1227 = vmatmul.mubr.bf16.gmra.mrb[48].mxu1 %v2671_v17 }
  0xb5   : > { %1234 = vmatprep.mubr.bf16.mxu1 %v2674_v18 }
  0xbc   : > { %1235 = vmatmul.mubr.bf16.gmra.mrb[52].mxu1 %v2677_v20 }
  0xbd   : > { %1242 = vmatprep.mubr.bf16.mxu1 %v2680_v21 }
  0xc4   : > { %1243 = vmatmul.mubr.bf16.gmra.mrb[56].mxu1 %v2683_v23 }
  0xc5   : > { %1250 = vmatprep.mubr.bf16.mxu1 %v2686_v24 }
  0xcc   : > { %1251 = vmatmul.mubr.bf16.gmra.mrb[60].mxu1 %v2689_v27 }
  0xcd   : > { %1258 = vmatprep.mubr.bf16.mxu1 %v2690_v28 }
  0xd4   : > { %1259 = vmatmul.mubr.bf16.gmra.mrb[64].mxu1 %v2692_v31 }
  0xd5   : > { %1266 = vmatprep.mubr.bf16.mxu1 %v2693_v32 }
  0xdc   : > { %1267 = vmatmul.mubr.bf16.gmra.mrb[68].mxu1 %v2695_v35 }
  0xdd   : > { %1274 = vmatprep.mubr.bf16.mxu1 %v2696_v36 }
  0xe4   : > { %1275 = vmatmul.mubr.bf16.gmra.mrb[72].mxu1 %v2698_v37 }
  0xe5   : > { %1282 = vmatprep.mubr.bf16.mxu1 %v2699_v38 }
  0xec   : > { %1283 = vmatmul.mubr.bf16.gmra.mrb[76].mxu1 %v2701_v39 }
 0x127   : > { %v2293_v40 = vpop.f32.mrb[0].mxu1  ;;  %v2221_v46 = vpop.f32.mrb[0].mxu0 }
 0x128   : > { %v2294_v41 = vpop.f32.mrb[1].mxu1  ;;  %v2222_v48 = vpop.f32.mrb[1].mxu0 }
 0x129   : > { %v3107_v42 = vadd.f32 %v2294_v41, %v2293_v40  ;;  %v2296_v43 = vpop.f32.mrb[2].mxu1  ;;  %v2223_v50 = vadd.f32 %v2222_v48, %v2221_v46  ;;  %v2224_v51 = vpop.f32.mrb[2].mxu0 }
 0x12a   : > { %v2297_v44 = vpop.f32.mrb[3].mxu1  ;;  %v2225_v54 = vpop.f32.mrb[3].mxu0 }
 0x12b   : > { %v3109_v45 = vadd.f32 %v2297_v44, %v2296_v43  ;;  %v2226_v56 = vadd.f32 %v2225_v54, %v2224_v51 }
 0x12f   : > { %v2299_v47 = vpop.f32.mrb[4].mxu1  ;;  %v2227_v58 = vpop.f32.mrb[4].mxu0 }
 0x130   : > { %v2300_v49 = vpop.f32.mrb[5].mxu1  ;;  %v2228_v60 = vpop.f32.mrb[5].mxu0 }
 0x131   : > { %v3111_v52 = vadd.f32 %v2300_v49, %v2299_v47  ;;  %v2302_v53 = vpop.f32.mrb[6].mxu1  ;;  %v2229_v62 = vadd.f32 %v2228_v60, %v2227_v58  ;;  %v2230_v63 = vpop.f32.mrb[6].mxu0 }
 0x132   : > { %v2303_v55 = vpop.f32.mrb[7].mxu1  ;;  %v2231_v2 = vpop.f32.mrb[7].mxu0 }
 0x133   : > { %v3113_v57 = vadd.f32 %v2303_v55, %v2302_v53  ;;  %v2232_v4 = vadd.f32 %v2231_v2, %v2230_v63 }
 0x137   : > { %v2305_v59 = vpop.f32.mrb[8].mxu1  ;;  %v2233_v6 = vpop.f32.mrb[8].mxu0 }
 0x138   : > { %v2306_v61 = vpop.f32.mrb[9].mxu1  ;;  %v2234_v8 = vpop.f32.mrb[9].mxu0 }
 0x139   : > { %v3115_v0 = vadd.f32 %v2306_v61, %v2305_v59  ;;  %v2308_v1 = vpop.f32.mrb[10].mxu1  ;;  %v2235_v10 = vadd.f32 %v2234_v8, %v2233_v6  ;;  %v2236_v11 = vpop.f32.mrb[10].mxu0 }
 0x13a   : > { %v2309_v3 = vpop.f32.mrb[11].mxu1  ;;  %v2237_v14 = vpop.f32.mrb[11].mxu0 }
 0x13b   : > { %v3117_v5 = vadd.f32 %v2309_v3, %v2308_v1  ;;  %v2238_v16 = vadd.f32 %v2237_v14, %v2236_v11 }
 0x13f   : > { %v2311_v7 = vpop.f32.mrb[12].mxu1  ;;  %v2239_v18 = vpop.f32.mrb[12].mxu0 }
 0x140   : > { %v2312_v9 = vpop.f32.mrb[13].mxu1  ;;  %v2240_v20 = vpop.f32.mrb[13].mxu0 }
 0x141   : > { %v3119_v12 = vadd.f32 %v2312_v9, %v2311_v7  ;;  %v2314_v13 = vpop.f32.mrb[14].mxu1  ;;  %v2241_v22 = vadd.f32 %v2240_v20, %v2239_v18  ;;  %v2242_v23 = vpop.f32.mrb[14].mxu0 }
 0x142   : > { %v2315_v15 = vpop.f32.mrb[15].mxu1  ;;  %v2243_v26 = vpop.f32.mrb[15].mxu0 }
 0x143   : > { %v3121_v17 = vadd.f32 %v2315_v15, %v2314_v13  ;;  %v2244_v28 = vadd.f32 %v2243_v26, %v2242_v23 }
 0x147   : > { %v2333_v19 = vpop.f32.mrb[16].mxu1  ;;  %v2245_v32 = vpop.f32.mrb[16].mxu0 }
 0x148   : > { %v2334_v21 = vpop.f32.mrb[17].mxu1  ;;  %v2246_v36 = vpop.f32.mrb[17].mxu0 }
 0x149   : > { %v2335_v24 = vadd.f32 %v2334_v21, %v2333_v19  ;;  %v2336_v25 = vpop.f32.mrb[18].mxu1  ;;  %v2247_v38 = vadd.f32 %v2246_v36, %v2245_v32  ;;  %v2248_v39 = vpop.f32.mrb[18].mxu0 }
 0x14a   : > { %v2337_v27 = vpop.f32.mrb[19].mxu1  ;;  %v2249_v44 = vpop.f32.mrb[19].mxu0 }
 0x14b   : > { %v1165_v29 = vadd.f32 %v2335_v24, %v2223_v50  ;;  %v2338_v30 = vadd.f32 %v2337_v27, %v2336_v25  ;;  %v2250_v47 = vadd.f32 %v2249_v44, %v2248_v39 }
 0x14d   : > { %v1168_v31 = vadd.f32 %v2338_v30, %v2226_v56  ;;  %v1390_v33 = vmax.f32 %v1165_v29, 0.0 }
 0x14f   : > { %v1391_v34 = vmax.f32 %v1168_v31, 0.0  ;;  %v2339_v35 = vpop.f32.mrb[20].mxu1  ;;  %v2251_v51 = vpop.f32.mrb[20].mxu0 }
 0x150   : > { %v2340_v37 = vpop.f32.mrb[21].mxu1  ;;  %v2252_v56 = vpop.f32.mrb[21].mxu0 }
 0x151   : > { %v2341_v40 = vadd.f32 %v2340_v37, %v2339_v35  ;;  %v2342_v41 = vpop.f32.mrb[22].mxu1  ;;  %v1422_v43 = vpack.c.bf16 %v1391_v34, %v1390_v33  ;;  %v2253_v59 = vadd.f32 %v2252_v56, %v2251_v51  ;;  %v2254_v60 = vpop.f32.mrb[22].mxu0 }
 0x152   : > { %v2343_v46 = vpop.f32.mrb[23].mxu1  ;;  %v2255_v2 = vpop.f32.mrb[23].mxu0 }
 0x153   : > { %v1173_v48 = vadd.f32 %v2341_v40, %v2229_v62  ;;  %v2344_v49 = vadd.f32 %v2343_v46, %v2342_v41  ;;  %2469 = vmatprep.mubr.bf16.mxu0 %v1422_v43  ;;  %v2256_v6 = vadd.f32 %v2255_v2, %v2254_v60 }
 0x155   : > { %v1176_v50 = vadd.f32 %v2344_v49, %v2232_v4  ;;  %v1392_v53 = vmax.f32 %v1173_v48, 0.0 }
 0x157   : > { %v1393_v54 = vmax.f32 %v1176_v50, 0.0  ;;  %v2345_v55 = vpop.f32.mrb[24].mxu1  ;;  %v2257_v9 = vpop.f32.mrb[24].mxu0 }
 0x158   : > { %v2346_v58 = vpop.f32.mrb[25].mxu1  ;;  %v2258_v14 = vpop.f32.mrb[25].mxu0 }
 0x159   : > { %v1423_v61 = vpack.c.bf16 %v1393_v54, %v1392_v53  ;;  %v2347_v63 = vadd.f32 %v2346_v58, %v2345_v55  ;;  %v2348_v1 = vpop.f32.mrb[26].mxu1  ;;  %v2259_v18 = vadd.f32 %v2258_v14, %v2257_v9  ;;  %v2260_v19 = vpop.f32.mrb[26].mxu0 }
 0x15a   : > { %v2349_v3 = vpop.f32.mrb[27].mxu1  ;;  %v2261_v24 = vpop.f32.mrb[27].mxu0 }
 0x15b   : > { %v1181_v7 = vadd.f32 %v2347_v63, %v2235_v10  ;;  %v2350_v8 = vadd.f32 %v2349_v3, %v2348_v1  ;;  %2470 = vmatmul.mubr.bf16.vlgmr.msra.gmra.mrb[48].mxu0 %v1423_v61  ;;  %v2262_v26 = vadd.f32 %v2261_v24, %v2260_v19 }
 0x15d   : > { %v1184_v62 = vadd.f32 %v2350_v8, %v2238_v16  ;;  %v1394_v4 = vmax.f32 %v1181_v7, 0.0 }
 0x15f   : > { %v1395_v11 = vmax.f32 %v1184_v62, 0.0  ;;  %v2351_v13 = vpop.f32.mrb[28].mxu1  ;;  %v2263_v30 = vpop.f32.mrb[28].mxu0 }
 0x160   : > { %v2352_v15 = vpop.f32.mrb[29].mxu1  ;;  %v2264_v33 = vpop.f32.mrb[29].mxu0 }
 0x161   : > { %v2353_v20 = vadd.f32 %v2352_v15, %v2351_v13  ;;  %v2354_v21 = vpop.f32.mrb[30].mxu1  ;;  %v1424_v23 = vpack.c.bf16 %v1395_v11, %v1394_v4  ;;  %v2265_v35 = vadd.f32 %v2264_v33, %v2263_v30  ;;  %v2266_v36 = vpop.f32.mrb[30].mxu0 }
 0x162   : > { %v2355_v25 = vpop.f32.mrb[31].mxu1  ;;  %v2267_v41 = vpop.f32.mrb[31].mxu0 }
 0x163   : > { %v1189_v27 = vadd.f32 %v2353_v20, %v2241_v22  ;;  %v2356_v29 = vadd.f32 %v2355_v25, %v2354_v21  ;;  %2473 = vmatprep.mubr.bf16.mxu0 %v1424_v23  ;;  %v2268_v44 = vadd.f32 %v2267_v41, %v2266_v36 }
 0x165   : > { %v1192_v10 = vadd.f32 %v2356_v29, %v2244_v28  ;;  %v1396_v16 = vmax.f32 %v1189_v27, 0.0 }
 0x167   : > { %v1397_v31 = vmax.f32 %v1192_v10, 0.0  ;;  %v2357_v32 = vpop.f32.mrb[32].mxu1  ;;  %v2269_v49 = vpop.f32.mrb[32].mxu0 }
 0x168   : > { %v2358_v34 = vpop.f32.mrb[33].mxu1  ;;  %v2270_v53 = vpop.f32.mrb[33].mxu0 }
 0x169   : > { %v2359_v37 = vadd.f32 %v2358_v34, %v2357_v32  ;;  %v2360_v39 = vpop.f32.mrb[34].mxu1  ;;  %v1425_v40 = vpack.c.bf16 %v1397_v31, %v1396_v16  ;;  %v2271_v55 = vadd.f32 %v2270_v53, %v2269_v49  ;;  %v2272_v56 = vpop.f32.mrb[34].mxu0 }
 0x16a   : > { %v2361_v43 = vpop.f32.mrb[35].mxu1  ;;  %v2273_v63 = vpop.f32.mrb[35].mxu0 }
 0x16b   : > { %v1197_v46 = vadd.f32 %v2359_v37, %v2247_v38  ;;  %v2362_v48 = vadd.f32 %v2361_v43, %v2360_v39  ;;  %2474 = vmatmul.mubr.bf16.gmra.mrb[52].mxu0 %v1425_v40  ;;  %v2274_v2 = vadd.f32 %v2273_v63, %v2272_v56 }
 0x16d   : > { %v1200_v22 = vadd.f32 %v2362_v48, %v2250_v47  ;;  %v1398_v28 = vmax.f32 %v1197_v46, 0.0 }
 0x16f   : > { %v1399_v50 = vmax.f32 %v1200_v22, 0.0  ;;  %v2363_v51 = vpop.f32.mrb[36].mxu1  ;;  %v2275_v8 = vpop.f32.mrb[36].mxu0 }
 0x170   : > { %v2364_v54 = vpop.f32.mrb[37].mxu1  ;;  %v2276_v4 = vpop.f32.mrb[37].mxu0 }
 0x171   : > { %v2365_v58 = vadd.f32 %v2364_v54, %v2363_v51  ;;  %v2366_v60 = vpop.f32.mrb[38].mxu1  ;;  %v1426_v61 = vpack.c.bf16 %v1399_v50, %v1398_v28  ;;  %v2277_v13 = vadd.f32 %v2276_v4, %v2275_v8  ;;  %v2278_v14 = vpop.f32.mrb[38].mxu0 }
 0x172   : > { %v2367_v1 = vpop.f32.mrb[39].mxu1  ;;  %v2279_v21 = vpop.f32.mrb[39].mxu0 }
 0x173   : > { %v1205_v3 = vadd.f32 %v2365_v58, %v2253_v59  ;;  %v2368_v7 = vadd.f32 %v2367_v1, %v2366_v60  ;;  %2477 = vmatprep.mubr.bf16.mxu0 %v1426_v61  ;;  %v2280_v24 = vadd.f32 %v2279_v21, %v2278_v14 }
 0x175   : > { %v1208_v38 = vadd.f32 %v2368_v7, %v2256_v6  ;;  %v1400_v47 = vmax.f32 %v1205_v3, 0.0 }
 0x177   : > { %v1401_v62 = vmax.f32 %v1208_v38, 0.0  ;;  %v2369_v9 = vpop.f32.mrb[40].mxu1  ;;  %v2281_v29 = vpop.f32.mrb[40].mxu0 }
 0x178   : > { %v2370_v11 = vpop.f32.mrb[41].mxu1  ;;  %v2282_v16 = vpop.f32.mrb[41].mxu0 }
 0x179   : > { %v2371_v15 = vadd.f32 %v2370_v11, %v2369_v9  ;;  %v2372_v19 = vpop.f32.mrb[42].mxu1  ;;  %v1427_v20 = vpack.c.bf16 %v1401_v62, %v1400_v47  ;;  %v2283_v32 = vadd.f32 %v2282_v16, %v2281_v29  ;;  %v2284_v33 = vpop.f32.mrb[42].mxu0 }
 0x17a   : > { %v2373_v23 = vpop.f32.mrb[43].mxu1  ;;  %v2285_v39 = vpop.f32.mrb[43].mxu0 }
 0x17b   : > { %v1213_v25 = vadd.f32 %v2371_v15, %v2259_v18  ;;  %v2374_v27 = vadd.f32 %v2373_v23, %v2372_v19  ;;  %2478 = vmatmul.mubr.bf16.gmra.mrb[56].mxu0 %v1427_v20  ;;  %v2286_v41 = vadd.f32 %v2285_v39, %v2284_v33 }
 0x17d   : > { %v1216_v59 = vadd.f32 %v2374_v27, %v2262_v26  ;;  %v1402_v6 = vmax.f32 %v1213_v25, 0.0 }
 0x17f   : > { %v1403_v10 = vmax.f32 %v1216_v59, 0.0  ;;  %v2375_v30 = vpop.f32.mrb[44].mxu1  ;;  %v2287_v48 = vpop.f32.mrb[44].mxu0 }
 0x180   : > { %v2376_v31 = vpop.f32.mrb[45].mxu1  ;;  %v2288_v28 = vpop.f32.mrb[45].mxu0 }
 0x181   : > { %v2377_v34 = vadd.f32 %v2376_v31, %v2375_v30  ;;  %v2378_v36 = vpop.f32.mrb[46].mxu1  ;;  %v1428_v37 = vpack.c.bf16 %v1403_v10, %v1402_v6  ;;  %v2289_v51 = vadd.f32 %v2288_v28, %v2287_v48  ;;  %v2290_v53 = vpop.f32.mrb[46].mxu0 }
 0x182   : > { %v2379_v40 = vpop.f32.mrb[47].mxu1  ;;  %v2291_v60 = vpop.f32.mrb[47].mxu0 }
 0x183   : > { %v1221_v43 = vadd.f32 %v2377_v34, %v2265_v35  ;;  %v2380_v46 = vadd.f32 %v2379_v40, %v2378_v36  ;;  %2481 = vmatprep.mubr.bf16.mxu0 %v1428_v37  ;;  %v2292_v63 = vadd.f32 %v2291_v60, %v2290_v53 }
 0x185   : > { %v1224_v18 = vadd.f32 %v2380_v46, %v2268_v44  ;;  %v1404_v26 = vmax.f32 %v1221_v43, 0.0 }
 0x187   : > { %v1405_v22 = vmax.f32 %v1224_v18, 0.0  ;;  %v2381_v49 = vpop.f32.mrb[48].mxu1 }
 0x188   : > { %v2382_v50 = vpop.f32.mrb[49].mxu1 }
 0x189   : > { %v2383_v54 = vadd.f32 %v2382_v50, %v2381_v49  ;;  %v2384_v56 = vpop.f32.mrb[50].mxu1  ;;  %v1429_v58 = vpack.c.bf16 %v1405_v22, %v1404_v26 }
 0x18a   : > { %v2385_v61 = vpop.f32.mrb[51].mxu1 }
 0x18b   : > { %v1229_v1 = vadd.f32 %v2383_v54, %v2271_v55  ;;  %v2386_v3 = vadd.f32 %v2385_v61, %v2384_v56  ;;  %2482 = vmatmul.mubr.bf16.gmra.mrb[60].mxu0 %v1429_v58 }
 0x18d   : > { %v1232_v35 = vadd.f32 %v2386_v3, %v2274_v2  ;;  %v1406_v7 = vmax.f32 %v1229_v1, 0.0 }
 0x18f   : > { %v1407_v44 = vmax.f32 %v1232_v35, 0.0  ;;  %v2387_v38 = vpop.f32.mrb[52].mxu1 }
 0x190   : > { %v2388_v8 = vpop.f32.mrb[53].mxu1 }
 0x191   : > { %v2389_v47 = vadd.f32 %v2388_v8, %v2387_v38  ;;  %v2390_v62 = vpop.f32.mrb[54].mxu1  ;;  %v1430_v9 = vpack.c.bf16 %v1407_v44, %v1406_v7 }
 0x192   : > { %v2391_v4 = vpop.f32.mrb[55].mxu1 }
 0x193   : > { %v1237_v11 = vadd.f32 %v2389_v47, %v2277_v13  ;;  %v2392_v14 = vadd.f32 %v2391_v4, %v2390_v62  ;;  %2485 = vmatprep.mubr.bf16.mxu0 %v1430_v9 }
 0x195   : > { %v1240_v15 = vadd.f32 %v2392_v14, %v2280_v24  ;;  %v1408_v19 = vmax.f32 %v1237_v11, 0.0 }
 0x197   : > { %v1409_v20 = vmax.f32 %v1240_v15, 0.0  ;;  %v2393_v21 = vpop.f32.mrb[56].mxu1 }
 0x198   : > { %v2394_v23 = vpop.f32.mrb[57].mxu1 }
 0x199   : > { %v2395_v55 = vadd.f32 %v2394_v23, %v2393_v21  ;;  %v2396_v25 = vpop.f32.mrb[58].mxu1  ;;  %v1431_v27 = vpack.c.bf16 %v1409_v20, %v1408_v19 }
 0x19a   : > { %v2397_v2 = vpop.f32.mrb[59].mxu1 }
 0x19b   : > { %v1245_v59 = vadd.f32 %v2395_v55, %v2283_v32  ;;  %v2398_v29 = vadd.f32 %v2397_v2, %v2396_v25  ;;  %2486 = vmatmul.mubr.bf16.gmra.mrb[64].mxu0 %v1431_v27 }
 0x19d   : > { %v1248_v6 = vadd.f32 %v2398_v29, %v2286_v41  ;;  %v1410_v10 = vmax.f32 %v1245_v59, 0.0  ;;  %v3135_v59 = vld [vmem:[%s3211_s3] ss:$0 sm:$0xff] }
 0x19f   : > { %v1411_v30 = vmax.f32 %v1248_v6, 0.0  ;;  %v2399_v16 = vpop.f32.mrb[60].mxu1 }
 0x1a0   : > { %v2400_v31 = vpop.f32.mrb[61].mxu1 }
 0x1a1   : > { %v2401_v13 = vadd.f32 %v2400_v31, %v2399_v16  ;;  %v2402_v33 = vpop.f32.mrb[62].mxu1  ;;  %v1432_v34 = vpack.c.bf16 %v1411_v30, %v1410_v10 }
 0x1a2   : > { %v2403_v24 = vpop.f32.mrb[63].mxu1 }
 0x1a3   : > { %v1253_v36 = vadd.f32 %v2401_v13, %v2289_v51  ;;  %v2404_v37 = vadd.f32 %v2403_v24, %v2402_v33  ;;  %2489 = vmatprep.mubr.bf16.mxu0 %v1432_v34 }
 0x1a5   : > { %v1256_v39 = vadd.f32 %v2404_v37, %v2292_v63  ;;  %v1412_v40 = vmax.f32 %v1253_v36, 0.0 }
 0x1a7   : > { %v1413_v43 = vmax.f32 %v1256_v39, 0.0  ;;  %v2405_v46 = vpop.f32.mrb[64].mxu1 }
 0x1a8   : > { %v2406_v18 = vpop.f32.mrb[65].mxu1 }
 0x1a9   : > { %v2407_v32 = vadd.f32 %v2406_v18, %v2405_v46  ;;  %v2408_v48 = vpop.f32.mrb[66].mxu1  ;;  %v1433_v26 = vpack.c.bf16 %v1413_v43, %v1412_v40 }
 0x1aa   : > { %v2409_v41 = vpop.f32.mrb[67].mxu1 }
 0x1ab   : > { %v1261_v22 = vadd.f32 %v2407_v32, %v3107_v42  ;;  %v2410_v49 = vadd.f32 %v2409_v41, %v2408_v48  ;;  %2490 = vmatmul.mubr.bf16.gmra.mrb[68].mxu0 %v1433_v26 }
 0x1ad   : > { %v1264_v28 = vadd.f32 %v2410_v49, %v3109_v45  ;;  %v1414_v50 = vmax.f32 %v1261_v22, 0.0 }
 0x1af   : > { %v1415_v53 = vmax.f32 %v1264_v28, 0.0  ;;  %v2411_v51 = vpop.f32.mrb[68].mxu1 }
 0x1b0   : > { %v2412_v54 = vpop.f32.mrb[69].mxu1 }
 0x1b1   : > { %v2413_v56 = vadd.f32 %v2412_v54, %v2411_v51  ;;  %v2414_v58 = vpop.f32.mrb[70].mxu1  ;;  %v1434_v60 = vpack.c.bf16 %v1415_v53, %v1414_v50 }
 0x1b2   : > { %v2415_v61 = vpop.f32.mrb[71].mxu1 }
 0x1b3   : > { %v1269_v63 = vadd.f32 %v2413_v56, %v3111_v52  ;;  %v2416_v1 = vadd.f32 %v2415_v61, %v2414_v58  ;;  %2493 = vmatprep.mubr.bf16.mxu0 %v1434_v60 }
 0x1b5   : > { %v1272_v3 = vadd.f32 %v2416_v1, %v3113_v57  ;;  %v1416_v35 = vmax.f32 %v1269_v63, 0.0 }
 0x1b7   : > { %v1417_v42 = vmax.f32 %v1272_v3, 0.0  ;;  %v2417_v7 = vpop.f32.mrb[72].mxu1 }
 0x1b8   : > { %v2418_v44 = vpop.f32.mrb[73].mxu1 }
 0x1b9   : > { %v2419_v38 = vadd.f32 %v2418_v44, %v2417_v7  ;;  %v2420_v45 = vpop.f32.mrb[74].mxu1  ;;  %v1435_v8 = vpack.c.bf16 %v1417_v42, %v1416_v35 }
 0x1ba   : > { %v2421_v47 = vpop.f32.mrb[75].mxu1 }
 0x1bb   : > { %v1277_v62 = vadd.f32 %v2419_v38, %v3115_v0  ;;  %v2422_v9 = vadd.f32 %v2421_v47, %v2420_v45  ;;  %2494 = vmatmul.mubr.bf16.gmra.mrb[72].mxu0 %v1435_v8 }
 0x1bd   : > { %v1280_v4 = vadd.f32 %v2422_v9, %v3117_v5  ;;  %v1418_v11 = vmax.f32 %v1277_v62, 0.0 }
 0x1bf   : > { %v1419_v52 = vmax.f32 %v1280_v4, 0.0  ;;  %v2423_v14 = vpop.f32.mrb[76].mxu1 }
 0x1c0   : > { %v2424_v15 = vpop.f32.mrb[77].mxu1 }
 0x1c1   : > { %v2425_v57 = vadd.f32 %v2424_v15, %v2423_v14  ;;  %v2426_v19 = vpop.f32.mrb[78].mxu1  ;;  %v1436_v20 = vpack.c.bf16 %v1419_v52, %v1418_v11 }
 0x1c2   : > { %v2427_v21 = vpop.f32.mrb[79].mxu1 }
 0x1c3   : > { %v1285_v23 = vadd.f32 %v2425_v57, %v3119_v12  ;;  %v2428_v55 = vadd.f32 %v2427_v21, %v2426_v19  ;;  %2497 = vmatprep.mubr.bf16.mxu0 %v1436_v20 }
 0x1c5   : > { %v1288_v25 = vadd.f32 %v2428_v55, %v3121_v17  ;;  %v1420_v0 = vmax.f32 %v1285_v23, 0.0 }
 0x1c7   : > { %v1421_v27 = vmax.f32 %v1288_v25, 0.0 }
 0x1c9   : > { %v1437_v2 = vpack.c.bf16 %v1421_v27, %v1420_v0 }
 0x1cb   : > { %2498 = vmatmul.mubr.bf16.gmra.mrb[76].mxu0 %v1437_v2 }
 0x22e   : > { %v2471_v5 = vpop.f32.mrb[48].mxu0 }
 0x22f   : > { %v1543_v29 = vpop.f32.mrb[49].mxu0  ;;  %v1552_v6 = vadd.f32 %v2471_v5, %v3135_v59 }
 0x230   : > { %v2472_v12 = vpop.f32.mrb[50].mxu0  ;;  %v1544_v30 = vadd.f32 %v3135_v59, %v1543_v29 }
 0x231   : > { %v1555_v17 = vadd.f32 %v2472_v12, %v3135_v59  ;;  %v1546_v10 = vpop.f32.mrb[51].mxu0 }
 0x232   : > { %v1547_v16 = vadd.f32 %v3135_v59, %v1546_v10 }
 0x233   : > { %v2118_v31 = vpack.c.bf16 %v1555_v17, %v1552_v6 }
 0x234   : > { %v2113_v13 = vpack.c.bf16 %v1547_v16, %v1544_v30 }
 0x235   : > { %2190 = vst [vmem:[%s3143_s29 + $0x8] sm:$0xff] %v2118_v31  }
 0x236   : > { %2114 = vst [vmem:[%s3143_s29] sm:$0xff] %v2113_v13  }
 0x23e   : > { %v2475_v33 = vpop.f32.mrb[52].mxu0 }
 0x23f   : > { %v1559_v34 = vpop.f32.mrb[53].mxu0  ;;  %v1568_v36 = vadd.f32 %v2475_v33, %v3135_v59 }
 0x240   : > { %v2476_v24 = vpop.f32.mrb[54].mxu0  ;;  %v1560_v40 = vadd.f32 %v3135_v59, %v1559_v34 }
 0x241   : > { %v1571_v37 = vadd.f32 %v2476_v24, %v3135_v59  ;;  %v1562_v39 = vpop.f32.mrb[55].mxu0 }
 0x242   : > { %v1563_v43 = vadd.f32 %v3135_v59, %v1562_v39 }
 0x243   : > { %v2128_v46 = vpack.c.bf16 %v1571_v37, %v1568_v36 }
 0x244   : > { %v2123_v18 = vpack.c.bf16 %v1563_v43, %v1560_v40 }
 0x245   : > { %2192 = vst [vmem:[%s3143_s29 + $0x18] sm:$0xff] %v2128_v46  }
 0x246   : > { %2191 = vst [vmem:[%s3143_s29 + $0x10] sm:$0xff] %v2123_v18  }
 0x24e   : > { %v2479_v32 = vpop.f32.mrb[56].mxu0 }
 0x24f   : > { %v1575_v48 = vpop.f32.mrb[57].mxu0  ;;  %v1584_v41 = vadd.f32 %v2479_v32, %v3135_v59 }
 0x250   : > { %v2480_v26 = vpop.f32.mrb[58].mxu0  ;;  %v1576_v28 = vadd.f32 %v3135_v59, %v1575_v48 }
 0x251   : > { %v1587_v22 = vadd.f32 %v2480_v26, %v3135_v59  ;;  %v1578_v49 = vpop.f32.mrb[59].mxu0 }
 0x252   : > { %v1579_v50 = vadd.f32 %v3135_v59, %v1578_v49 }
 0x253   : > { %v2138_v53 = vpack.c.bf16 %v1587_v22, %v1584_v41 }
 0x254   : > { %v2133_v51 = vpack.c.bf16 %v1579_v50, %v1576_v28 }
 0x255   : > { %2194 = vst [vmem:[%s3143_s29 + $0x28] sm:$0xff] %v2138_v53  }
 0x256   : > { %2193 = vst [vmem:[%s3143_s29 + $0x20] sm:$0xff] %v2133_v51  }
 0x25e   : > { %v2483_v54 = vpop.f32.mrb[60].mxu0 }
 0x25f   : > { %v1591_v56 = vpop.f32.mrb[61].mxu0  ;;  %v1600_v60 = vadd.f32 %v2483_v54, %v3135_v59 }
 0x260   : > { %v2484_v58 = vpop.f32.mrb[62].mxu0  ;;  %v1592_v1 = vadd.f32 %v3135_v59, %v1591_v56 }
 0x261   : > { %v1603_v61 = vadd.f32 %v2484_v58, %v3135_v59  ;;  %v1594_v63 = vpop.f32.mrb[63].mxu0 }
 0x262   : > { %v1595_v3 = vadd.f32 %v3135_v59, %v1594_v63 }
 0x263   : > { %v2148_v35 = vpack.c.bf16 %v1603_v61, %v1600_v60 }
 0x264   : > { %v2143_v42 = vpack.c.bf16 %v1595_v3, %v1592_v1 }
 0x265   : > { %2196 = vst [vmem:[%s3143_s29 + $0x38] sm:$0xff] %v2148_v35  }
 0x266   : > { %2195 = vst [vmem:[%s3143_s29 + $0x30] sm:$0xff] %v2143_v42  }
 0x26e   : > { %v2487_v7 = vpop.f32.mrb[64].mxu0 }
 0x26f   : > { %v1607_v44 = vpop.f32.mrb[65].mxu0  ;;  %v1616_v45 = vadd.f32 %v2487_v7, %v3135_v59 }
 0x270   : > { %v2488_v38 = vpop.f32.mrb[66].mxu0  ;;  %v1608_v62 = vadd.f32 %v3135_v59, %v1607_v44 }
 0x271   : > { %v1619_v8 = vadd.f32 %v2488_v38, %v3135_v59  ;;  %v1610_v47 = vpop.f32.mrb[67].mxu0 }
 0x272   : > { %v1611_v9 = vadd.f32 %v3135_v59, %v1610_v47 }
 0x273   : > { %v2158_v4 = vpack.c.bf16 %v1619_v8, %v1616_v45 }
 0x274   : > { %v2153_v11 = vpack.c.bf16 %v1611_v9, %v1608_v62 }
 0x275   : > { %2198 = vst [vmem:[%s3143_s29 + $0x48] sm:$0xff] %v2158_v4  }
 0x276   : > { %2197 = vst [vmem:[%s3143_s29 + $0x40] sm:$0xff] %v2153_v11  }
 0x27e   : > { %v2491_v52 = vpop.f32.mrb[68].mxu0 }
 0x27f   : > { %v1623_v14 = vpop.f32.mrb[69].mxu0  ;;  %v1632_v57 = vadd.f32 %v2491_v52, %v3135_v59 }
 0x280   : > { %v2492_v15 = vpop.f32.mrb[70].mxu0  ;;  %v1624_v21 = vadd.f32 %v3135_v59, %v1623_v14 }
 0x281   : > { %v1635_v19 = vadd.f32 %v2492_v15, %v3135_v59  ;;  %v1626_v20 = vpop.f32.mrb[71].mxu0 }
 0x282   : > { %v1627_v23 = vadd.f32 %v3135_v59, %v1626_v20 }
 0x283   : > { %v2168_v55 = vpack.c.bf16 %v1635_v19, %v1632_v57 }
 0x284   : > { %v2163_v25 = vpack.c.bf16 %v1627_v23, %v1624_v21 }
 0x285   : > { %2200 = vst [vmem:[%s3143_s29 + $0x58] sm:$0xff] %v2168_v55  }
 0x286   : > { %2199 = vst [vmem:[%s3143_s29 + $0x50] sm:$0xff] %v2163_v25  }
 0x28e   : > { %v2495_v0 = vpop.f32.mrb[72].mxu0 }
 0x28f   : > { %v1639_v27 = vpop.f32.mrb[73].mxu0  ;;  %v1648_v5 = vadd.f32 %v2495_v0, %v3135_v59 }
 0x290   : > { %v2496_v2 = vpop.f32.mrb[74].mxu0  ;;  %v1640_v6 = vadd.f32 %v3135_v59, %v1639_v27 }
 0x291   : > { %v1651_v29 = vadd.f32 %v2496_v2, %v3135_v59  ;;  %v1642_v12 = vpop.f32.mrb[75].mxu0 }
 0x292   : > { %v1643_v17 = vadd.f32 %v3135_v59, %v1642_v12 }
 0x293   : > { %v2178_v10 = vpack.c.bf16 %v1651_v29, %v1648_v5 }
 0x294   : > { %v2173_v30 = vpack.c.bf16 %v1643_v17, %v1640_v6 }
 0x295   : > { %2202 = vst [vmem:[%s3143_s29 + $0x68] sm:$0xff] %v2178_v10  }
 0x296   : > { %2201 = vst [vmem:[%s3143_s29 + $0x60] sm:$0xff] %v2173_v30  }
 0x29e   : > { %v2499_v16 = vpop.f32.mrb[76].mxu0 }
 0x29f   : > { %v1655_v31 = vpop.f32.mrb[77].mxu0  ;;  %v1664_v33 = vadd.f32 %v2499_v16, %v3135_v59 }
 0x2a0   : > { %v2500_v13 = vpop.f32.mrb[78].mxu0  ;;  %v1656_v36 = vadd.f32 %v3135_v59, %v1655_v31 }
 0x2a1   : > { %v1667_v34 = vadd.f32 %v2500_v13, %v3135_v59  ;;  %v1658_v24 = vpop.f32.mrb[79].mxu0 }
 0x2a2   : > { %v1659_v37 = vadd.f32 %v3135_v59, %v1658_v24 }
 0x2a3   : > { %v2188_v39 = vpack.c.bf16 %v1667_v34, %v1664_v33 }
 0x2a4   : > { %v2183_v40 = vpack.c.bf16 %v1659_v37, %v1656_v36 }
 0x2a5   : > { %2204 = vst [vmem:[%s3143_s29 + $0x78] sm:$0xff] %v2188_v39  }
 0x2a6   : > { %2203 = vst [vmem:[%s3143_s29 + $0x70] sm:$0xff] %v2183_v40  }
 0x2a7 PF: > { %s17_s20 = sadd.s32 1, %s2790_s20   ;;  %s3216_s15 = smov %s2774_s16 }
 0x2a8   : > { %p14_p9 = scmp.ge.s32.totalorder %s17_s20, 4   ;;  %s3217_s16 = smov %s2778_s17 }
 0x2a9   : > { %s3218_s17 = smov %s2869_s27  ;;  %s3219_s18 = smov %s2786_s19 }
 0x2aa   : > { %s3220_s19 = smov %s3222_s22  ;;  %16 = sbr.rel (!%p14_p9) target bundleno = 4 (0x4), region = 87 }
 0x2b1   :  { %1852 = vsyncpa [#allocation4], 1 }
 0x2b2   :  { %1854 = vsyncpa [#allocation4 + $0x1], 1 }

</bundles_post_ra>
